<compile_context>
chip_gen: v7x
topology: tpu7x:2x2x1
jax: 0.10.0
libtpu: 0.0.40
codegen_flags: <defaults>
</compile_context>

<pallas_src>
import numpy as np
import jax
import jax.numpy as jnp
from jax.experimental import pallas as pl
from jax.experimental.pallas import tpu as pltpu

_EPS = 1e-5
_LANES = 128


def _sigmoid(v):
    # Plain 1/(1+exp(-v)) to stay numerically close to the pure-JAX reference
    # (pl.reciprocal(approx=True) would use the EUP divide but diverges).
    return 1.0 / (1.0 + jnp.exp(-v))


def _silu(v):
    return v * _sigmoid(v)


def _softplus(v):
    # Overflow-stable softplus: max(v, 0) + log(1 + exp(-|v|)).
    return jnp.maximum(v, 0.0) + jnp.log(1.0 + jnp.exp(-jnp.abs(v)))


def _pack_params(params):
    """Host-side one-time prep: algebraic fusions + pack into one (rows,128) slab."""
    d_model, two_d_inner = params["w_in"].shape
    d_inner = two_d_inner // 2
    dt_rank = params["w_dt"].shape[0]

    # Fold RMSNorm weight into in_proj.
    w_in_f = (params["w_in"] * params["w_rms"].reshape(d_model, 1)).astype(jnp.float32)
    # Fuse dt_proj into x_proj (no nonlinearity in between; b_dt added in-kernel).
    w_xdt = jnp.concatenate(
        [params["w_x"][:, :dt_rank] @ params["w_dt"], params["w_x"][:, dt_rank:]],
        axis=1).astype(jnp.float32)                                   # (d_inner, d_inner+2N)
    # A = -exp(A_log), transposed for the (B, N, d_inner) scan-state layout.
    neg_a_t = (-jnp.exp(jnp.transpose(params["a_log"]))).astype(jnp.float32)  # (N, d_inner)
    # Fuse out_proj and fc (both linear, no activation between).
    w_head_t = jnp.transpose(params["w_out"] @ params["w_fc"]).astype(jnp.float32)

    pieces = [
        ("w_in", w_in_f),
        ("w_conv", params["w_conv"].astype(jnp.float32)),
        ("b_conv", params["b_conv"].astype(jnp.float32)),
        ("w_xdt", w_xdt),
        ("b_dt", params["b_dt"].astype(jnp.float32)),
        ("neg_a_t", neg_a_t),
        ("d_skip", params["d_skip"].astype(jnp.float32)),
        ("w_head_t", w_head_t),
        ("b_fc", params["b_fc"].astype(jnp.float32)),
    ]
    layout = {}
    blocks = []
    row = 0
    for name, arr in pieces:
        r, c = arr.shape
        assert c <= _LANES, name
        r_pad = -(-r // 8) * 8                     # sublane-align every block start
        layout[name] = (row, r, c)
        blocks.append(jnp.pad(arr, ((0, r_pad - r), (0, _LANES - c))))
        row += r_pad
    slab = jnp.concatenate(blocks, axis=0)         # (row, 128) f32, one DMA
    return slab, layout


def _make_mamba_kernel(layout, *, B, L, d_model, d_inner, N, K, num_classes):
    def kernel(x_ref, pk_ref, out_ref):
        def pk(name):
            r0, nr, nc = layout[name]
            return pk_ref[r0:r0 + nr, 0:nc]        # static, 8-aligned sublane slice

        x = x_ref[...].astype(jnp.float32)                         # (B, L, d_model)

        # --- RMSNorm (weight folded into w_in on the host) ---
        var = jnp.mean(x * x, axis=-1, keepdims=True)              # (B, L, 1)
        xs = x * jax.lax.rsqrt(var + _EPS)                         # (B, L, d_model)

        # --- in_proj: K = d_model (tiny) -> VPU broadcast FMAs ---
        w_in = pk("w_in")                                          # (d_model, 2*d_inner)
        xz = xs[..., 0:1] * w_in[0:1, :]
        for j in range(1, d_model):                                # static, d_model = 2
            xz = xz + xs[..., j:j + 1] * w_in[j:j + 1, :]          # (B, L, 2*d_inner)
        x_in = xz[..., :d_inner]                                   # (B, L, d_inner)
        z_last = xz[:, L - 1:L, d_inner:]                          # (B, 1, d_inner)

        # --- depthwise causal conv1d, dead taps skipped ---
        # Taps k < K-L only ever touch the zero pad, so start at k0 = max(0, K-L)
        # and pad only min(K-1, L-1) rows (K=16, L=8 -> 8 live taps, not 16).
        w_conv = pk("w_conv")                                      # (K, d_inner)
        k0 = max(0, K - L)
        P = min(K - 1, L - 1)
        xpad = jnp.concatenate(
            [jnp.zeros((B, P, d_inner), jnp.float32), x_in], axis=1)   # (B, P+L, d_inner)
        conv = xpad[:, 0:L, :] * w_conv[k0:k0 + 1, :] + pk("b_conv")
        for j in range(1, K - k0):                                 # static unroll
            conv = conv + xpad[:, j:j + L, :] * w_conv[k0 + j:k0 + j + 1, :]
        x_c = _silu(conv)                                          # (B, L, d_inner)

        # --- fused x_proj . dt_proj: one lane-dense 128-wide MXU matmul ---
        w_xdt = pk("w_xdt")                                        # (d_inner, d_inner+2N)
        dbc = jnp.dot(x_c.reshape(B * L, d_inner), w_xdt,
                      preferred_element_type=jnp.float32)
        dbc = dbc.reshape(B, L, d_inner + 2 * N)
        delta = _softplus(dbc[..., :d_inner] + pk("b_dt"))         # (B, L, d_inner)
        bc = dbc[..., d_inner:]                                    # (B, L, 2N)

        # --- selective scan, state h: (B, N, d_inner) ---
        neg_a = pk("neg_a_t")[None, :, :]                          # (1, N, d_inner) = -exp(A_log).T
        g = delta * x_c                                            # (B, L, d_inner)
        bc_sw = jnp.transpose(bc, (0, 2, 1))                       # (B, 2N, L), once per call
        b_sw = bc_sw[:, :N, :]                                     # (B, N, L)
        c_col = bc_sw[:, N:, L - 1:L]                              # (B, N, 1) (last step only)
        # All exp() and all lane-width-1 B extracts / lane broadcasts are hoisted
        # out of the recurrence; the loop-carried chain below is pure FMAs.
        decays = [jnp.exp(delta[:, t:t + 1, :] * neg_a) for t in range(L)]   # (B,N,d_inner) each
        gbs = [g[:, t:t + 1, :] * b_sw[:, :, t:t + 1] for t in range(L)]      # (B,N,d_inner) each
        h = jnp.zeros((B, N, d_inner), jnp.float32)
        # Short sequence (L = 8): static unroll.  For long L switch to
        # lax.fori_loop(..., unroll=True) / a time-chunked grid with an h carry.
        for t in range(L):
            h = decays[t] * h + gbs[t]

        # --- classifier head uses only the last time step ---
        y = jnp.sum(h * c_col, axis=1, keepdims=True)              # (B, 1, d_inner)
        y = y + pk("d_skip") * x_c[:, L - 1:L, :]                  # D skip
        y = y * _silu(z_last)                                      # SiLU gate
        y2 = y.reshape(B, d_inner)                                 # (B, d_inner)

        # --- fused out_proj . fc head (host-fused; fp order differs slightly
        #     from the two-matmul reference, within tolerance) ---
        w_head_t = pk("w_head_t")                                  # (num_classes, d_inner)
        if num_classes == 1:
            logits = jnp.sum(y2 * w_head_t, axis=-1, keepdims=True)
        else:
            logits = jax.lax.dot_general(
                y2, w_head_t, (((1,), (1,)), ((), ())),
                preferred_element_type=jnp.float32)
        out_ref[...] = (logits + pk("b_fc")).astype(out_ref.dtype)

    return kernel


def mamba_classifier_forward(x, params):
    """x: (B, L, input_size) float32 -> logits: (B, num_classes) float32."""
    B, L, d_model = x.shape
    K, d_inner = params["w_conv"].shape
    N = params["a_log"].shape[1]
    num_classes = params["w_fc"].shape[1]

    slab, layout = _pack_params(params)
    kernel = _make_mamba_kernel(layout, B=B, L=L, d_model=d_model,
                                d_inner=d_inner, N=N, K=K,
                                num_classes=num_classes)

    return pl.pallas_call(
        kernel,
        out_shape=jax.ShapeDtypeStruct((B, num_classes), jnp.float32),
        grid=(1,),                                   # whole batch in one step
        in_specs=[
            pl.BlockSpec(x.shape, lambda i: (0, 0, 0)),
            pl.BlockSpec(slab.shape, lambda i: (0, 0)),
        ],
        out_specs=pl.BlockSpec((B, num_classes), lambda i: (0, 0)),
        compiler_params=pltpu.CompilerParams(
            dimension_semantics=("arbitrary",)),
    )(x, slab)


def init_params(key, *, d_model, d_inner, d_state, d_conv, dt_rank,
                num_classes):
    ks = jax.random.split(key, 7)
    s = 0.1
    a_row = jnp.arange(1, d_state + 1, dtype=jnp.float32)
    return {
        "w_rms": jnp.ones((1, d_model), jnp.float32),
        "w_in": s * jax.random.normal(ks[0], (d_model, 2 * d_inner), jnp.float32),
        "w_conv": s * jax.random.normal(ks[1], (d_conv, d_inner), jnp.float32),
        "b_conv": s * jax.random.normal(ks[2], (1, d_inner), jnp.float32),
        "w_x": s * jax.random.normal(ks[3], (d_inner, dt_rank + 2 * d_state), jnp.float32),
        "w_dt": s * jax.random.normal(ks[4], (dt_rank, d_inner), jnp.float32),
        "b_dt": jnp.full((1, d_inner), 0.05, jnp.float32),
        "a_log": jnp.log(jnp.tile(a_row[None, :], (d_inner, 1))),
        "d_skip": jnp.ones((1, d_inner), jnp.float32),
        "w_out": s * jax.random.normal(ks[5], (d_inner, d_inner), jnp.float32),
        "w_fc": s * jax.random.normal(ks[6], (d_inner, num_classes), jnp.float32),
        "b_fc": jnp.zeros((1, num_classes), jnp.float32),
    }


def forward_reference(x, p):
    """Pure-JAX reference with the original (unfused) math, per-batch loops."""
    B, L, _ = x.shape
    d_conv, d_inner = p["w_conv"].shape
    N = p["a_log"].shape[1]
    dt_rank = p["w_dt"].shape[0]
    outs = []
    for b in range(B):
        xb = x[b].astype(jnp.float32)
        var = jnp.mean(xb * xb, axis=-1, keepdims=True)
        xn = xb * jax.lax.rsqrt(var + _EPS) * p["w_rms"]
        xz = xn @ p["w_in"]
        x_in, z = xz[:, :d_inner], xz[:, d_inner:]
        xpad = jnp.concatenate(
            [jnp.zeros((d_conv - 1, d_inner), jnp.float32), x_in], axis=0)
        conv = sum(xpad[k:k + L, :] * p["w_conv"][k:k + 1, :]
                   for k in range(d_conv)) + p["b_conv"]
        x_c = _silu(conv)
        dbc = x_c @ p["w_x"]
        delta_r = dbc[:, :dt_rank]
        b_mat = dbc[:, dt_rank:dt_rank + N]
        c_mat = dbc[:, dt_rank + N:]
        delta = _softplus(delta_r @ p["w_dt"] + p["b_dt"])
        a_mat = -jnp.exp(p["a_log"])
        h = jnp.zeros((d_inner, N), jnp.float32)
        for t in range(L):
            h = (jnp.exp(delta[t][:, None] * a_mat) * h
                 + (delta[t] * x_c[t])[:, None] * b_mat[t][None, :])
        y = (h * c_mat[L - 1][None, :]).sum(axis=-1) + p["d_skip"][0] * x_c[L - 1]
        y = y * _silu(z[L - 1])
        hid = y @ p["w_out"]
        outs.append(hid @ p["w_fc"] + p["b_fc"][0])
    return jnp.stack(outs, axis=0)


if __name__ == "__main__":
    # Shapes implied by the module: input_size = problemDim = 2,
    # hidden_size = 64 (= d_inner = expand_factor * d_model), d_state = 32,
    # d_conv = 16, num_classes = 1.
    input_size = 2
    hidden_size = 64
    d_state = 32
    d_conv = 16
    dt_rank = max(1, -(-input_size // 16))   # ceil(d_model / 16) = 1
    num_classes = 1
    batch, seq_len = 2, 8

    root = jax.random.PRNGKey(0)
    k_x, k_p = jax.random.split(root)
    x = jax.random.normal(k_x, (batch, seq_len, input_size), jnp.float32)
    params = init_params(k_p, d_model=input_size, d_inner=hidden_size,
                         d_state=d_state, d_conv=d_conv, dt_rank=dt_rank,
                         num_classes=num_classes)

    logits = mamba_classifier_forward(x, params)
    logits = jax.block_until_ready(logits)
    assert logits.shape == (batch, num_classes)

    ref = forward_reference(x, params)
    np.testing.assert_allclose(np.asarray(logits), np.asarray(ref),
                               rtol=2e-3, atol=2e-3)
    print("KERNEL_OK")
</pallas_src>

<mosaic_0001>
module attributes {stable_mosaic.version = 11 : i64} {
  func.func @kernel(%arg0: i32, %arg1: memref<2x8x2xf32, #tpu.memory_space<vmem>>, %arg2: memref<160x128xf32, #tpu.memory_space<vmem>>, %arg3: memref<2x1xf32, #tpu.memory_space<vmem>>) attributes {dimension_semantics = [#tpu.dimension_semantics<arbitrary>], iteration_bounds = array<i64: 1>, scalar_prefetch = 0 : i64, scratch_operands = 0 : i64, tpu.core_type = #tpu.core_type<tc>, window_params = [{pipeline_mode = #tpu.pipeline_mode<synchronous>, transform_indices = @transform_0, window_bounds = array<i64: 2, 8, 2>}, {pipeline_mode = #tpu.pipeline_mode<synchronous>, transform_indices = @transform_1, window_bounds = array<i64: 160, 128>}, {pipeline_mode = #tpu.pipeline_mode<synchronous>, transform_indices = @transform_2, window_bounds = array<i64: 2, 1>}]} {
    %c0 = arith.constant 0 : index
    %c0_0 = arith.constant 0 : index
    %c0_1 = arith.constant 0 : index
    %0 = vector.load %arg1[%c0, %c0_0, %c0_1] : memref<2x8x2xf32, #tpu.memory_space<vmem>>, vector<2x8x2xf32>
    %1 = arith.mulf %0, %0 : vector<2x8x2xf32>
    %cst = arith.constant dense<0.000000e+00> : vector<2x8xf32>
    %2 = vector.multi_reduction <add>, %1, %cst [2] : vector<2x8x2xf32> to vector<2x8xf32>
    %3 = vector.shape_cast %2 : vector<2x8xf32> to vector<2x8x1xf32>
    %cst_2 = arith.constant 2.000000e+00 : f32
    %4 = vector.broadcast %cst_2 : f32 to vector<2x8x1xf32>
    %5 = arith.divf %3, %4 : vector<2x8x1xf32>
    %cst_3 = arith.constant 9.99999974E-6 : f32
    %6 = vector.broadcast %cst_3 : f32 to vector<2x8x1xf32>
    %7 = arith.addf %5, %6 : vector<2x8x1xf32>
    %8 = math.rsqrt %7 : vector<2x8x1xf32>
    %9 = vector.broadcast %8 : vector<2x8x1xf32> to vector<2x8x2xf32>
    %10 = arith.mulf %0, %9 : vector<2x8x2xf32>
    %c0_4 = arith.constant 0 : index
    %c0_5 = arith.constant 0 : index
    %11 = vector.load %arg2[%c0_4, %c0_5] : memref<160x128xf32, #tpu.memory_space<vmem>>, vector<2x128xf32>
    %12 = vector.extract_strided_slice %10 {offsets = [0, 0, 0], sizes = [2, 8, 1], strides = [1, 1, 1]} : vector<2x8x2xf32> to vector<2x8x1xf32>
    %13 = vector.extract_strided_slice %11 {offsets = [0, 0], sizes = [1, 128], strides = [1, 1]} : vector<2x128xf32> to vector<1x128xf32>
    %14 = vector.shape_cast %13 : vector<1x128xf32> to vector<1x1x128xf32>
    %15 = vector.broadcast %12 : vector<2x8x1xf32> to vector<2x8x128xf32>
    %16 = vector.broadcast %14 : vector<1x1x128xf32> to vector<2x8x128xf32>
    %17 = arith.mulf %15, %16 : vector<2x8x128xf32>
    %18 = vector.extract_strided_slice %10 {offsets = [0, 0, 1], sizes = [2, 8, 1], strides = [1, 1, 1]} : vector<2x8x2xf32> to vector<2x8x1xf32>
    %19 = vector.extract_strided_slice %11 {offsets = [1, 0], sizes = [1, 128], strides = [1, 1]} : vector<2x128xf32> to vector<1x128xf32>
    %20 = vector.shape_cast %19 : vector<1x128xf32> to vector<1x1x128xf32>
    %21 = vector.broadcast %18 : vector<2x8x1xf32> to vector<2x8x128xf32>
    %22 = vector.broadcast %20 : vector<1x1x128xf32> to vector<2x8x128xf32>
    %23 = arith.mulf %21, %22 : vector<2x8x128xf32>
    %24 = arith.addf %17, %23 : vector<2x8x128xf32>
    %25 = vector.extract_strided_slice %24 {offsets = [0, 0, 0], sizes = [2, 8, 64], strides = [1, 1, 1]} : vector<2x8x128xf32> to vector<2x8x64xf32>
    %26 = vector.extract_strided_slice %24 {offsets = [0, 7, 64], sizes = [2, 1, 64], strides = [1, 1, 1]} : vector<2x8x128xf32> to vector<2x1x64xf32>
    %c8 = arith.constant 8 : index
    %c0_6 = arith.constant 0 : index
    %27 = vector.load %arg2[%c8, %c0_6] : memref<160x128xf32, #tpu.memory_space<vmem>>, vector<16x64xf32>
    %cst_7 = arith.constant 0.000000e+00 : f32
    %28 = vector.broadcast %cst_7 : f32 to vector<2x7x64xf32>
    %29 = tpu.concatenate %28, %25 in 1 : vector<2x7x64xf32>, vector<2x8x64xf32> -> vector<2x15x64xf32>
    %30 = vector.extract_strided_slice %29 {offsets = [0, 0, 0], sizes = [2, 8, 64], strides = [1, 1, 1]} : vector<2x15x64xf32> to vector<2x8x64xf32>
    %31 = vector.extract_strided_slice %27 {offsets = [8, 0], sizes = [1, 64], strides = [1, 1]} : vector<16x64xf32> to vector<1x64xf32>
    %32 = vector.shape_cast %31 : vector<1x64xf32> to vector<1x1x64xf32>
    %33 = vector.broadcast %32 : vector<1x1x64xf32> to vector<2x8x64xf32>
    %34 = arith.mulf %30, %33 : vector<2x8x64xf32>
    %c24 = arith.constant 24 : index
    %c0_8 = arith.constant 0 : index
    %35 = vector.load %arg2[%c24, %c0_8] : memref<160x128xf32, #tpu.memory_space<vmem>>, vector<1x64xf32>
    %36 = vector.shape_cast %35 : vector<1x64xf32> to vector<1x1x64xf32>
    %37 = vector.broadcast %36 : vector<1x1x64xf32> to vector<2x8x64xf32>
    %38 = arith.addf %34, %37 : vector<2x8x64xf32>
    %39 = vector.extract_strided_slice %29 {offsets = [0, 1, 0], sizes = [2, 8, 64], strides = [1, 1, 1]} : vector<2x15x64xf32> to vector<2x8x64xf32>
    %40 = vector.extract_strided_slice %27 {offsets = [9, 0], sizes = [1, 64], strides = [1, 1]} : vector<16x64xf32> to vector<1x64xf32>
    %41 = vector.shape_cast %40 : vector<1x64xf32> to vector<1x1x64xf32>
    %42 = vector.broadcast %41 : vector<1x1x64xf32> to vector<2x8x64xf32>
    %43 = arith.mulf %39, %42 : vector<2x8x64xf32>
    %44 = arith.addf %38, %43 : vector<2x8x64xf32>
    %45 = vector.extract_strided_slice %29 {offsets = [0, 2, 0], sizes = [2, 8, 64], strides = [1, 1, 1]} : vector<2x15x64xf32> to vector<2x8x64xf32>
    %46 = vector.extract_strided_slice %27 {offsets = [10, 0], sizes = [1, 64], strides = [1, 1]} : vector<16x64xf32> to vector<1x64xf32>
    %47 = vector.shape_cast %46 : vector<1x64xf32> to vector<1x1x64xf32>
    %48 = vector.broadcast %47 : vector<1x1x64xf32> to vector<2x8x64xf32>
    %49 = arith.mulf %45, %48 : vector<2x8x64xf32>
    %50 = arith.addf %44, %49 : vector<2x8x64xf32>
    %51 = vector.extract_strided_slice %29 {offsets = [0, 3, 0], sizes = [2, 8, 64], strides = [1, 1, 1]} : vector<2x15x64xf32> to vector<2x8x64xf32>
    %52 = vector.extract_strided_slice %27 {offsets = [11, 0], sizes = [1, 64], strides = [1, 1]} : vector<16x64xf32> to vector<1x64xf32>
    %53 = vector.shape_cast %52 : vector<1x64xf32> to vector<1x1x64xf32>
    %54 = vector.broadcast %53 : vector<1x1x64xf32> to vector<2x8x64xf32>
    %55 = arith.mulf %51, %54 : vector<2x8x64xf32>
    %56 = arith.addf %50, %55 : vector<2x8x64xf32>
    %57 = vector.extract_strided_slice %29 {offsets = [0, 4, 0], sizes = [2, 8, 64], strides = [1, 1, 1]} : vector<2x15x64xf32> to vector<2x8x64xf32>
    %58 = vector.extract_strided_slice %27 {offsets = [12, 0], sizes = [1, 64], strides = [1, 1]} : vector<16x64xf32> to vector<1x64xf32>
    %59 = vector.shape_cast %58 : vector<1x64xf32> to vector<1x1x64xf32>
    %60 = vector.broadcast %59 : vector<1x1x64xf32> to vector<2x8x64xf32>
    %61 = arith.mulf %57, %60 : vector<2x8x64xf32>
    %62 = arith.addf %56, %61 : vector<2x8x64xf32>
    %63 = vector.extract_strided_slice %29 {offsets = [0, 5, 0], sizes = [2, 8, 64], strides = [1, 1, 1]} : vector<2x15x64xf32> to vector<2x8x64xf32>
    %64 = vector.extract_strided_slice %27 {offsets = [13, 0], sizes = [1, 64], strides = [1, 1]} : vector<16x64xf32> to vector<1x64xf32>
    %65 = vector.shape_cast %64 : vector<1x64xf32> to vector<1x1x64xf32>
    %66 = vector.broadcast %65 : vector<1x1x64xf32> to vector<2x8x64xf32>
    %67 = arith.mulf %63, %66 : vector<2x8x64xf32>
    %68 = arith.addf %62, %67 : vector<2x8x64xf32>
    %69 = vector.extract_strided_slice %29 {offsets = [0, 6, 0], sizes = [2, 8, 64], strides = [1, 1, 1]} : vector<2x15x64xf32> to vector<2x8x64xf32>
    %70 = vector.extract_strided_slice %27 {offsets = [14, 0], sizes = [1, 64], strides = [1, 1]} : vector<16x64xf32> to vector<1x64xf32>
    %71 = vector.shape_cast %70 : vector<1x64xf32> to vector<1x1x64xf32>
    %72 = vector.broadcast %71 : vector<1x1x64xf32> to vector<2x8x64xf32>
    %73 = arith.mulf %69, %72 : vector<2x8x64xf32>
    %74 = arith.addf %68, %73 : vector<2x8x64xf32>
    %75 = vector.extract_strided_slice %29 {offsets = [0, 7, 0], sizes = [2, 8, 64], strides = [1, 1, 1]} : vector<2x15x64xf32> to vector<2x8x64xf32>
    %76 = vector.extract_strided_slice %27 {offsets = [15, 0], sizes = [1, 64], strides = [1, 1]} : vector<16x64xf32> to vector<1x64xf32>
    %77 = vector.shape_cast %76 : vector<1x64xf32> to vector<1x1x64xf32>
    %78 = vector.broadcast %77 : vector<1x1x64xf32> to vector<2x8x64xf32>
    %79 = arith.mulf %75, %78 : vector<2x8x64xf32>
    %80 = arith.addf %74, %79 : vector<2x8x64xf32>
    %cst_9 = arith.constant 0.000000e+00 : f32
    %81 = vector.broadcast %cst_9 : f32 to vector<2x8x64xf32>
    %82 = arith.subf %81, %80 : vector<2x8x64xf32>
    %83 = math.exp %82 : vector<2x8x64xf32>
    %cst_10 = arith.constant 1.000000e+00 : f32
    %84 = vector.broadcast %cst_10 : f32 to vector<2x8x64xf32>
    %85 = arith.addf %84, %83 : vector<2x8x64xf32>
    %cst_11 = arith.constant 1.000000e+00 : f32
    %86 = vector.broadcast %cst_11 : f32 to vector<2x8x64xf32>
    %87 = arith.divf %86, %85 : vector<2x8x64xf32>
    %88 = arith.mulf %80, %87 : vector<2x8x64xf32>
    %c32 = arith.constant 32 : index
    %c0_12 = arith.constant 0 : index
    %89 = vector.load %arg2[%c32, %c0_12] : memref<160x128xf32, #tpu.memory_space<vmem>>, vector<64x128xf32>
    %90 = vector.shape_cast %88 : vector<2x8x64xf32> to vector<16x64xf32>
    %cst_13 = arith.constant dense<0.000000e+00> : vector<16x128xf32>
    %91 = tpu.matmul %90, %89, %cst_13 {dimension_numbers = #tpu.dot_dimension_numbers<[1], [0], [0], [1], [0, 0, 1, 1], [], []>} : vector<16x64xf32>, vector<64x128xf32>, vector<16x128xf32> -> vector<16x128xf32>
    %92 = vector.shape_cast %91 : vector<16x128xf32> to vector<2x8x128xf32>
    %93 = vector.extract_strided_slice %92 {offsets = [0, 0, 0], sizes = [2, 8, 64], strides = [1, 1, 1]} : vector<2x8x128xf32> to vector<2x8x64xf32>
    %c96 = arith.constant 96 : index
    %c0_14 = arith.constant 0 : index
    %94 = vector.load %arg2[%c96, %c0_14] : memref<160x128xf32, #tpu.memory_space<vmem>>, vector<1x64xf32>
    %95 = vector.shape_cast %94 : vector<1x64xf32> to vector<1x1x64xf32>
    %96 = vector.broadcast %95 : vector<1x1x64xf32> to vector<2x8x64xf32>
    %97 = arith.addf %93, %96 : vector<2x8x64xf32>
    %cst_15 = arith.constant 0.000000e+00 : f32
    %98 = vector.broadcast %cst_15 : f32 to vector<2x8x64xf32>
    %99 = arith.maximumf %97, %98 : vector<2x8x64xf32>
    %100 = math.absf %97 : vector<2x8x64xf32>
    %cst_16 = arith.constant 0.000000e+00 : f32
    %101 = vector.broadcast %cst_16 : f32 to vector<2x8x64xf32>
    %102 = arith.subf %101, %100 : vector<2x8x64xf32>
    %103 = math.exp %102 : vector<2x8x64xf32>
    %cst_17 = arith.constant 1.000000e+00 : f32
    %104 = vector.broadcast %cst_17 : f32 to vector<2x8x64xf32>
    %105 = arith.addf %104, %103 : vector<2x8x64xf32>
    %106 = math.log %105 : vector<2x8x64xf32>
    %107 = arith.addf %99, %106 : vector<2x8x64xf32>
    %108 = vector.extract_strided_slice %92 {offsets = [0, 0, 64], sizes = [2, 8, 64], strides = [1, 1, 1]} : vector<2x8x128xf32> to vector<2x8x64xf32>
    %c104 = arith.constant 104 : index
    %c0_18 = arith.constant 0 : index
    %109 = vector.load %arg2[%c104, %c0_18] : memref<160x128xf32, #tpu.memory_space<vmem>>, vector<32x64xf32>
    %110 = vector.shape_cast %109 : vector<32x64xf32> to vector<1x32x64xf32>
    %111 = arith.mulf %107, %88 : vector<2x8x64xf32>
    %112 = tpu.transpose %108, [0, 2, 1] : vector<2x8x64xf32> -> vector<2x64x8xf32>
    %113 = vector.extract_strided_slice %112 {offsets = [0, 0, 0], sizes = [2, 32, 8], strides = [1, 1, 1]} : vector<2x64x8xf32> to vector<2x32x8xf32>
    %114 = vector.extract_strided_slice %112 {offsets = [0, 32, 7], sizes = [2, 32, 1], strides = [1, 1, 1]} : vector<2x64x8xf32> to vector<2x32x1xf32>
    %115 = vector.extract_strided_slice %107 {offsets = [0, 0, 0], sizes = [2, 1, 64], strides = [1, 1, 1]} : vector<2x8x64xf32> to vector<2x1x64xf32>
    %116 = vector.broadcast %115 : vector<2x1x64xf32> to vector<2x32x64xf32>
    %117 = vector.broadcast %110 : vector<1x32x64xf32> to vector<2x32x64xf32>
    %118 = arith.mulf %116, %117 : vector<2x32x64xf32>
    %119 = math.exp %118 : vector<2x32x64xf32>
    %120 = vector.extract_strided_slice %107 {offsets = [0, 1, 0], sizes = [2, 1, 64], strides = [1, 1, 1]} : vector<2x8x64xf32> to vector<2x1x64xf32>
    %121 = vector.broadcast %120 : vector<2x1x64xf32> to vector<2x32x64xf32>
    %122 = vector.broadcast %110 : vector<1x32x64xf32> to vector<2x32x64xf32>
    %123 = arith.mulf %121, %122 : vector<2x32x64xf32>
    %124 = math.exp %123 : vector<2x32x64xf32>
    %125 = vector.extract_strided_slice %107 {offsets = [0, 2, 0], sizes = [2, 1, 64], strides = [1, 1, 1]} : vector<2x8x64xf32> to vector<2x1x64xf32>
    %126 = vector.broadcast %125 : vector<2x1x64xf32> to vector<2x32x64xf32>
    %127 = vector.broadcast %110 : vector<1x32x64xf32> to vector<2x32x64xf32>
    %128 = arith.mulf %126, %127 : vector<2x32x64xf32>
    %129 = math.exp %128 : vector<2x32x64xf32>
    %130 = vector.extract_strided_slice %107 {offsets = [0, 3, 0], sizes = [2, 1, 64], strides = [1, 1, 1]} : vector<2x8x64xf32> to vector<2x1x64xf32>
    %131 = vector.broadcast %130 : vector<2x1x64xf32> to vector<2x32x64xf32>
    %132 = vector.broadcast %110 : vector<1x32x64xf32> to vector<2x32x64xf32>
    %133 = arith.mulf %131, %132 : vector<2x32x64xf32>
    %134 = math.exp %133 : vector<2x32x64xf32>
    %135 = vector.extract_strided_slice %107 {offsets = [0, 4, 0], sizes = [2, 1, 64], strides = [1, 1, 1]} : vector<2x8x64xf32> to vector<2x1x64xf32>
    %136 = vector.broadcast %135 : vector<2x1x64xf32> to vector<2x32x64xf32>
    %137 = vector.broadcast %110 : vector<1x32x64xf32> to vector<2x32x64xf32>
    %138 = arith.mulf %136, %137 : vector<2x32x64xf32>
    %139 = math.exp %138 : vector<2x32x64xf32>
    %140 = vector.extract_strided_slice %107 {offsets = [0, 5, 0], sizes = [2, 1, 64], strides = [1, 1, 1]} : vector<2x8x64xf32> to vector<2x1x64xf32>
    %141 = vector.broadcast %140 : vector<2x1x64xf32> to vector<2x32x64xf32>
    %142 = vector.broadcast %110 : vector<1x32x64xf32> to vector<2x32x64xf32>
    %143 = arith.mulf %141, %142 : vector<2x32x64xf32>
    %144 = math.exp %143 : vector<2x32x64xf32>
    %145 = vector.extract_strided_slice %107 {offsets = [0, 6, 0], sizes = [2, 1, 64], strides = [1, 1, 1]} : vector<2x8x64xf32> to vector<2x1x64xf32>
    %146 = vector.broadcast %145 : vector<2x1x64xf32> to vector<2x32x64xf32>
    %147 = vector.broadcast %110 : vector<1x32x64xf32> to vector<2x32x64xf32>
    %148 = arith.mulf %146, %147 : vector<2x32x64xf32>
    %149 = math.exp %148 : vector<2x32x64xf32>
    %150 = vector.extract_strided_slice %107 {offsets = [0, 7, 0], sizes = [2, 1, 64], strides = [1, 1, 1]} : vector<2x8x64xf32> to vector<2x1x64xf32>
    %151 = vector.broadcast %150 : vector<2x1x64xf32> to vector<2x32x64xf32>
    %152 = vector.broadcast %110 : vector<1x32x64xf32> to vector<2x32x64xf32>
    %153 = arith.mulf %151, %152 : vector<2x32x64xf32>
    %154 = math.exp %153 : vector<2x32x64xf32>
    %155 = vector.extract_strided_slice %111 {offsets = [0, 0, 0], sizes = [2, 1, 64], strides = [1, 1, 1]} : vector<2x8x64xf32> to vector<2x1x64xf32>
    %156 = vector.extract_strided_slice %113 {offsets = [0, 0, 0], sizes = [2, 32, 1], strides = [1, 1, 1]} : vector<2x32x8xf32> to vector<2x32x1xf32>
    %157 = vector.broadcast %155 : vector<2x1x64xf32> to vector<2x32x64xf32>
    %158 = vector.broadcast %156 : vector<2x32x1xf32> to vector<2x32x64xf32>
    %159 = arith.mulf %157, %158 : vector<2x32x64xf32>
    %160 = vector.extract_strided_slice %111 {offsets = [0, 1, 0], sizes = [2, 1, 64], strides = [1, 1, 1]} : vector<2x8x64xf32> to vector<2x1x64xf32>
    %161 = vector.extract_strided_slice %113 {offsets = [0, 0, 1], sizes = [2, 32, 1], strides = [1, 1, 1]} : vector<2x32x8xf32> to vector<2x32x1xf32>
    %162 = vector.broadcast %160 : vector<2x1x64xf32> to vector<2x32x64xf32>
    %163 = vector.broadcast %161 : vector<2x32x1xf32> to vector<2x32x64xf32>
    %164 = arith.mulf %162, %163 : vector<2x32x64xf32>
    %165 = vector.extract_strided_slice %111 {offsets = [0, 2, 0], sizes = [2, 1, 64], strides = [1, 1, 1]} : vector<2x8x64xf32> to vector<2x1x64xf32>
    %166 = vector.extract_strided_slice %113 {offsets = [0, 0, 2], sizes = [2, 32, 1], strides = [1, 1, 1]} : vector<2x32x8xf32> to vector<2x32x1xf32>
    %167 = vector.broadcast %165 : vector<2x1x64xf32> to vector<2x32x64xf32>
    %168 = vector.broadcast %166 : vector<2x32x1xf32> to vector<2x32x64xf32>
    %169 = arith.mulf %167, %168 : vector<2x32x64xf32>
    %170 = vector.extract_strided_slice %111 {offsets = [0, 3, 0], sizes = [2, 1, 64], strides = [1, 1, 1]} : vector<2x8x64xf32> to vector<2x1x64xf32>
    %171 = vector.extract_strided_slice %113 {offsets = [0, 0, 3], sizes = [2, 32, 1], strides = [1, 1, 1]} : vector<2x32x8xf32> to vector<2x32x1xf32>
    %172 = vector.broadcast %170 : vector<2x1x64xf32> to vector<2x32x64xf32>
    %173 = vector.broadcast %171 : vector<2x32x1xf32> to vector<2x32x64xf32>
    %174 = arith.mulf %172, %173 : vector<2x32x64xf32>
    %175 = vector.extract_strided_slice %111 {offsets = [0, 4, 0], sizes = [2, 1, 64], strides = [1, 1, 1]} : vector<2x8x64xf32> to vector<2x1x64xf32>
    %176 = vector.extract_strided_slice %113 {offsets = [0, 0, 4], sizes = [2, 32, 1], strides = [1, 1, 1]} : vector<2x32x8xf32> to vector<2x32x1xf32>
    %177 = vector.broadcast %175 : vector<2x1x64xf32> to vector<2x32x64xf32>
    %178 = vector.broadcast %176 : vector<2x32x1xf32> to vector<2x32x64xf32>
    %179 = arith.mulf %177, %178 : vector<2x32x64xf32>
    %180 = vector.extract_strided_slice %111 {offsets = [0, 5, 0], sizes = [2, 1, 64], strides = [1, 1, 1]} : vector<2x8x64xf32> to vector<2x1x64xf32>
    %181 = vector.extract_strided_slice %113 {offsets = [0, 0, 5], sizes = [2, 32, 1], strides = [1, 1, 1]} : vector<2x32x8xf32> to vector<2x32x1xf32>
    %182 = vector.broadcast %180 : vector<2x1x64xf32> to vector<2x32x64xf32>
    %183 = vector.broadcast %181 : vector<2x32x1xf32> to vector<2x32x64xf32>
    %184 = arith.mulf %182, %183 : vector<2x32x64xf32>
    %185 = vector.extract_strided_slice %111 {offsets = [0, 6, 0], sizes = [2, 1, 64], strides = [1, 1, 1]} : vector<2x8x64xf32> to vector<2x1x64xf32>
    %186 = vector.extract_strided_slice %113 {offsets = [0, 0, 6], sizes = [2, 32, 1], strides = [1, 1, 1]} : vector<2x32x8xf32> to vector<2x32x1xf32>
    %187 = vector.broadcast %185 : vector<2x1x64xf32> to vector<2x32x64xf32>
    %188 = vector.broadcast %186 : vector<2x32x1xf32> to vector<2x32x64xf32>
    %189 = arith.mulf %187, %188 : vector<2x32x64xf32>
    %190 = vector.extract_strided_slice %111 {offsets = [0, 7, 0], sizes = [2, 1, 64], strides = [1, 1, 1]} : vector<2x8x64xf32> to vector<2x1x64xf32>
    %191 = vector.extract_strided_slice %113 {offsets = [0, 0, 7], sizes = [2, 32, 1], strides = [1, 1, 1]} : vector<2x32x8xf32> to vector<2x32x1xf32>
    %192 = vector.broadcast %190 : vector<2x1x64xf32> to vector<2x32x64xf32>
    %193 = vector.broadcast %191 : vector<2x32x1xf32> to vector<2x32x64xf32>
    %194 = arith.mulf %192, %193 : vector<2x32x64xf32>
    %cst_19 = arith.constant 0.000000e+00 : f32
    %195 = vector.broadcast %cst_19 : f32 to vector<2x32x64xf32>
    %196 = arith.mulf %119, %195 : vector<2x32x64xf32>
    %197 = arith.addf %196, %159 : vector<2x32x64xf32>
    %198 = arith.mulf %124, %197 : vector<2x32x64xf32>
    %199 = arith.addf %198, %164 : vector<2x32x64xf32>
    %200 = arith.mulf %129, %199 : vector<2x32x64xf32>
    %201 = arith.addf %200, %169 : vector<2x32x64xf32>
    %202 = arith.mulf %134, %201 : vector<2x32x64xf32>
    %203 = arith.addf %202, %174 : vector<2x32x64xf32>
    %204 = arith.mulf %139, %203 : vector<2x32x64xf32>
    %205 = arith.addf %204, %179 : vector<2x32x64xf32>
    %206 = arith.mulf %144, %205 : vector<2x32x64xf32>
    %207 = arith.addf %206, %184 : vector<2x32x64xf32>
    %208 = arith.mulf %149, %207 : vector<2x32x64xf32>
    %209 = arith.addf %208, %189 : vector<2x32x64xf32>
    %210 = arith.mulf %154, %209 : vector<2x32x64xf32>
    %211 = arith.addf %210, %194 : vector<2x32x64xf32>
    %212 = vector.broadcast %114 : vector<2x32x1xf32> to vector<2x32x64xf32>
    %213 = arith.mulf %211, %212 : vector<2x32x64xf32>
    %cst_20 = arith.constant dense<0.000000e+00> : vector<2x64xf32>
    %214 = vector.multi_reduction <add>, %213, %cst_20 [1] : vector<2x32x64xf32> to vector<2x64xf32>
    %215 = vector.shape_cast %214 : vector<2x64xf32> to vector<2x1x64xf32>
    %c136 = arith.constant 136 : index
    %c0_21 = arith.constant 0 : index
    %216 = vector.load %arg2[%c136, %c0_21] : memref<160x128xf32, #tpu.memory_space<vmem>>, vector<1x64xf32>
    %217 = vector.extract_strided_slice %88 {offsets = [0, 7, 0], sizes = [2, 1, 64], strides = [1, 1, 1]} : vector<2x8x64xf32> to vector<2x1x64xf32>
    %218 = vector.shape_cast %216 : vector<1x64xf32> to vector<1x1x64xf32>
    %219 = vector.broadcast %218 : vector<1x1x64xf32> to vector<2x1x64xf32>
    %220 = arith.mulf %219, %217 : vector<2x1x64xf32>
    %221 = arith.addf %215, %220 : vector<2x1x64xf32>
    %cst_22 = arith.constant 0.000000e+00 : f32
    %222 = vector.broadcast %cst_22 : f32 to vector<2x1x64xf32>
    %223 = arith.subf %222, %26 : vector<2x1x64xf32>
    %224 = math.exp %223 : vector<2x1x64xf32>
    %cst_23 = arith.constant 1.000000e+00 : f32
    %225 = vector.broadcast %cst_23 : f32 to vector<2x1x64xf32>
    %226 = arith.addf %225, %224 : vector<2x1x64xf32>
    %cst_24 = arith.constant 1.000000e+00 : f32
    %227 = vector.broadcast %cst_24 : f32 to vector<2x1x64xf32>
    %228 = arith.divf %227, %226 : vector<2x1x64xf32>
    %229 = arith.mulf %26, %228 : vector<2x1x64xf32>
    %230 = arith.mulf %221, %229 : vector<2x1x64xf32>
    %231 = vector.shape_cast %230 : vector<2x1x64xf32> to vector<2x64xf32>
    %c144 = arith.constant 144 : index
    %c0_25 = arith.constant 0 : index
    %232 = vector.load %arg2[%c144, %c0_25] : memref<160x128xf32, #tpu.memory_space<vmem>>, vector<1x64xf32>
    %233 = vector.broadcast %232 : vector<1x64xf32> to vector<2x64xf32>
    %234 = arith.mulf %231, %233 : vector<2x64xf32>
    %cst_26 = arith.constant dense<0.000000e+00> : vector<2xf32>
    %235 = vector.multi_reduction <add>, %234, %cst_26 [1] : vector<2x64xf32> to vector<2xf32>
    %236 = vector.shape_cast %235 : vector<2xf32> to vector<2x1xf32>
    %c152 = arith.constant 152 : index
    %c0_27 = arith.constant 0 : index
    %237 = vector.load %arg2[%c152, %c0_27] : memref<160x128xf32, #tpu.memory_space<vmem>>, vector<1x1xf32>
    %238 = vector.broadcast %237 : vector<1x1xf32> to vector<2x1xf32>
    %239 = arith.addf %236, %238 : vector<2x1xf32>
    %c0_28 = arith.constant 0 : index
    %c0_29 = arith.constant 0 : index
    %240 = vector.load %arg3[%c0_28, %c0_29] : memref<2x1xf32, #tpu.memory_space<vmem>>, vector<2x1xf32>
    tpu.vector_store %arg3[%c0_28, %c0_29], %239 {strides = array<i32>} : memref<2x1xf32, #tpu.memory_space<vmem>>, vector<2x1xf32>,
    return
  }
  func.func @transform_0(%arg0: i32) -> (i32, i32, i32) {
    %c0_i32 = arith.constant 0 : i32
    %c0_i32_0 = arith.constant 0 : i32
    %c0_i32_1 = arith.constant 0 : i32
    %c0_i32_2 = arith.constant 0 : i32
    return %c0_i32, %c0_i32_0, %c0_i32_1 : i32, i32, i32
  }
  func.func @transform_1(%arg0: i32) -> (i32, i32) {
    %c0_i32 = arith.constant 0 : i32
    %c0_i32_0 = arith.constant 0 : i32
    %c0_i32_1 = arith.constant 0 : i32
    return %c0_i32, %c0_i32_0 : i32, i32
  }
  func.func @transform_2(%arg0: i32) -> (i32, i32) {
    %c0_i32 = arith.constant 0 : i32
    %c0_i32_0 = arith.constant 0 : i32
    %c0_i32_1 = arith.constant 0 : i32
    return %c0_i32, %c0_i32_0 : i32, i32
  }
}

</mosaic_0001>

<bundles_post_ra>
// kernel: tpu_custom_call.1
= control target key start
LH: loop header
LB: loop body
LE: loop exit
PB: predicated region body
PF: predicated region fallthrough
CT: control target
= control target key end

     0   :  { %7 = vsyncpa [#allocation3], 0  ;;  %s1695_s9 = smov [#allocation2]   ;;  %s2420_s0 = inlined_call_operand.vmem [shape: f32[2,8,2], index: 0, kind: input, shape index: {}]   ;;  %s2421_s1 = inlined_call_operand.hbm [shape: f32[160,128], index: 1, kind: input, shape index: {}]   ;;  %s2422_s2 = inlined_call_operand.vmem [shape: f32[2,1], index: 2, kind: output, shape index: {}]  }
   0x1   :  { %s15_s10 = sshll.u32 %s1695_s9, 4  ;;  %s1671_s13 = scalar_lea.hbm %s2421_s1, 2560  ;;  %s16_s10 = int_to_ptr.vmem [resolvable:$true] %s15_s10 }
   0x2   :  { %p1672_p0 = scmp.ne.s32.totalorder %s2421_s1, %s1671_s13  ;;  %p1675_p1 = scmp.lt.u32.totalorder %s1671_s13, %s2421_s1 }
   0x4   :  { %p1677_p2 = pnand %p1675_p1, %p1672_p0 }
   0x6   :  { %1680 = shalt.err (!%p1677_p2)
}
   0x7   :  { %s1681_s18 = scalar_lea.vmem %s16_s10, 2560  ;;  %p1686_p4 = scmp.lt.s32.totalorder %s16_s10, %s16_s10 }
   0x8   :  { %p1682_p3 = scmp.ne.s32.totalorder %s16_s10, %s1681_s18  ;;  %p1687_p5 = scmp.lt.s32.totalorder %s1681_s18, %s1681_s18 }
   0xa   :  { %p1688_p6 = por %p1687_p5, %p1686_p4 }
   0xc   :  { %p1689_p7 = pnand %p1688_p6, %p1682_p3 }
   0xe   :  { %1692 = shalt.err (!%p1689_p7)
}
   0xf   :  { %s1696_s19 = smov 128   ;;  %s1697_s20 = smov 8  }
  0x10   :  { %21 = dma.hbm_to_vmem [thread:$0]  %s2421_s1, 2560, %s16_s10, [#allocation3], %s1696_s19, %s1696_s19, %s1697_s20  }
  0x11   :  { %1693 = dma.done.wait [#allocation3], 2560  }
  0x12   :  { %1694 = vsyncadd [#allocation3], 4294964736  ;;  %v25_v0 = vld [vmem:[%s2420_s0] sm:$0xff]  ;;  %vm29_vm0 = vcmask 15360   ;;  %v26_v1 = vld [vmem:[%s2420_s0 + $0x8] sm:$0xff]  ;;  %v2428_v6 = vmov 0   ;;  %v56_v30 = vlaneseq }
  0x13   :  { %v27_v2 = vmul.f32 %v25_v0, %v25_v0  ;;  %v28_v3 = vmul.f32 %v26_v1, %v26_v1  ;;  %1447 = vset.pattern.permute.xlu1 %v2428_v6  ;;  %1449 = vset.pattern.permute.xlu0 %v2428_v6  ;;  %v2427_v17 = vmov 1   ;;  %v275_v18 = vld [vmem:[#allocation2 + $0x20] sm:$0xff]  ;;  %v276_v19 = vld [vmem:[#allocation2 + $0x28] sm:$0xff]  ;;  %v277_v20 = vld [vmem:[#allocation2 + $0x30] sm:$0xff]  ;;  %vm85_vm1 = vcmask 1046528   ;;  %s1700_s0 = smov 64  }
  0x14   :  { %v1418_v21 = vpack.c.bf16 %v276_v19, %v275_v18  ;;  %v278_v22 = vld [vmem:[#allocation2 + $0x38] sm:$0xff]  ;;  %v279_v24 = vld [vmem:[#allocation2 + $0x40] sm:$0xff]  ;;  %v280_v25 = vld [vmem:[#allocation2 + $0x48] sm:$0xff]  ;;  %v57_v31 = vshrl.u32 %v56_v30, 7  ;;  %vm135_vm2 = vcmask 1045504   ;;  %vm158_vm3 = vcmask 1044480  }
  0x15   :  { %v30_v4 = vsel %vm29_vm0, %v27_v2, 0.0  ;;  %v33_v5 = vsel %vm29_vm0, %v28_v3, 0.0  ;;  %v1422_v23 = vpack.c.bf16 %v278_v22, %v277_v20  ;;  %v1426_v26 = vpack.c.bf16 %v280_v25, %v279_v24  ;;  %v281_v27 = vld [vmem:[#allocation2 + $0x50] sm:$0xff]  ;;  %v282_v28 = vld [vmem:[#allocation2 + $0x58] sm:$0xff]  ;;  %v45_v34 = vld [vmem:[#allocation2] sm:$0x3] }
  0x16   :  { %31 = vadd.xlane.f32.xlu0 %v30_v4  ;;  %1419 = vmatprep.subr.bf16.mxu0 %v1418_v21  ;;  %v1430_v29 = vpack.c.bf16 %v282_v28, %v281_v27  ;;  %v1743_v32 = vsub.s32 0, %v57_v31  ;;  %v1745_v33 = vsub.s32 1, %v57_v31  ;;  %v78_v40 = vld [vmem:[#allocation2 + $0x10] sm:$0xff]  ;;  %v1749_v41 = vsub.s32 2, %v57_v31  ;;  %v1383_v61 = vld [vmem:[#allocation2 + $0x18] ss:$0 sm:$0xff] }
  0x17   :  { %1421 = vmatpush3.bf16.msra.mxu0 %v1418_v21  ;;  %v1751_v44 = vsub.s32 3, %v57_v31  ;;  %v1753_v45 = vsub.s32 4, %v57_v31  ;;  %v1760_v49 = vsub.s32 5, %v57_v31  ;;  %v1767_v55 = vsub.s32 6, %v57_v31 }
  0x18   :  { %1423 = vmatprep.subr.bf16.mxu0 %v1422_v23  ;;  %v59_v36 = vrot.slane %v45_v34, %v1743_v32  ;;  %v73_v37 = vrot.slane %v45_v34, %v1745_v33  ;;  %v1758_v48 = vrot.slane %v78_v40, %v1745_v33  ;;  %v91_v51 = vrot.slane %v78_v40, %v1743_v32 }
  0x19   :  { %v1764_v52 = vrot.slane %v78_v40, %v1749_v41  ;;  %v1769_v56 = vsub.s32 7, %v57_v31  ;;  %v1772_v57 = vrot.slane %v78_v40, %v1751_v44  ;;  %v1775_v58 = vrot.slane %v78_v40, %v1753_v45 }
  0x1a   :  { %34 = vadd.xlane.f32.xlu0 %v33_v5  ;;  %v1782_v63 = vrot.slane %v78_v40, %v1760_v49  ;;  %vm181_vm4 = vcmask 1043456   ;;  %vm204_vm5 = vcmask 1042432   ;;  %vm227_vm6 = vcmask 1041408  }
  0x1b   :  { %1425 = vmatpush3.bf16.msra.mxu0 %v1422_v23  ;;  %vm250_vm7 = vcmask 1040384   ;;  %vm283_vm8 = vcmask 523264   ;;  %vm1363_vm9 = vcmask 1041409   ;;  %vm1366_vm10 = vcmask 517120  }
  0x1c   :  { %1427 = vmatprep.subr.bf16.mxu0 %v1426_v26  ;;  %vm1376_vm11 = vcmask 1024  }
  0x1f   :  { %1429 = vmatpush3.bf16.msra.mxu0 %v1426_v26 }
  0x20   :  { %1431 = vmatprep.subr.bf16.mxu0 %v1430_v29 }
  0x23   :  { %1433 = vmatpush3.bf16.msra.mxu0 %v1430_v29 }
  0xa3   :  { %v32_v7 = vpop.xlane.xlu0 %31 }
  0xa4   :  { %v37_v8 = vmul.f32 0.5, %v32_v7  ;;  %v1791_v7 = vrot.slane %v78_v40, %v1767_v55 }
  0xa6   :  { %v39_v9 = vadd.f32 1e-05, %v37_v8  ;;  %v1794_v8 = vrot.slane %v78_v40, %v1769_v56 }
  0xa7   :  { %v35_v10 = vpop.xlane.xlu0 %34 }
  0xa8   :  { %1515 = vrsqrt.f32 %v39_v9  ;;  %v38_v11 = vmul.f32 0.5, %v35_v10 }
  0xaa   :  { %v40_v12 = vadd.f32 1e-05, %v38_v11 }
  0xac   :  { %1517 = vrsqrt.f32 %v40_v12 }
  0xb2   :  { %v1516_v13 = vpop.eup %1515 }
  0xb3   :  { %v43_v14 = vmul.f32 %v1516_v13, %v25_v0 }
  0xb5   :  { %48 = vperm.xlu1 %1447, %v43_v14  }
  0xb6   :  { %v1518_v15 = vpop.eup %1517 }
  0xb7   :  { %v44_v16 = vmul.f32 %v1518_v15, %v26_v1 }
  0xb9   :  { %1448 = vset.pattern.permute.xlu1 %v2427_v17  ;;  %53 = vperm.xlu0 %1449, %v44_v16  }
  0xba   :  { %63 = vperm.xlu1 %1448, %v43_v14  }
  0xbe   :  { %67 = vperm.xlu1 %1448, %v44_v16  }
 0x134   :  { %v49_v35 = vpop.permute.xlu1 %48 }
 0x135   :  { %v60_v42 = vmul.f32 %v59_v36, %v49_v35 }
 0x138   :  { %v54_v39 = vpop.permute.xlu0 %53 }
 0x139   :  { %v64_v38 = vpop.permute.xlu1 %63  ;;  %v61_v47 = vmul.f32 %v59_v36, %v54_v39 }
 0x13a   :  { %v74_v43 = vmul.f32 %v73_v37, %v64_v38 }
 0x13c   :  { %v1755_v46 = vadd.f32 %v74_v43, %v60_v42 }
 0x13d   :  { %v68_v50 = vpop.permute.xlu1 %67 }
 0x13e   :  { %v81_v53 = vrot.slane %v1755_v46, 1  ;;  %v75_v54 = vmul.f32 %v73_v37, %v68_v50 }
 0x140   :  { %v1777_v59 = vadd.f32 %v75_v54, %v61_v47  ;;  %v86_v60 = vsel %vm85_vm1, 0.0, %v81_v53  ;;  %v106_v62 = vmul.f32 %v1758_v48, %v81_v53  ;;  %v128_v3 = vmul.f32 %v1764_v52, %v81_v53 }
 0x141   :  { %v92_v0 = vmul.f32 %v91_v51, %v86_v60  ;;  %v105_v1 = vmul.f32 %v1758_v48, %v86_v60  ;;  %v127_v2 = vmul.f32 %v1764_v52, %v86_v60  ;;  %v150_v14 = vmul.f32 %v1772_v57, %v86_v60 }
 0x142   :  { %v1788_v4 = vrot.slane %v1777_v59, 1  ;;  %v114_v5 = vrot.slane %v106_v62, 1  ;;  %v137_v12 = vrot.slane %v128_v3, 2  ;;  %v151_v15 = vmul.f32 %v1772_v57, %v81_v53 }
 0x143   :  { %v99_v9 = vadd.f32 %v1383_v61, %v92_v0  ;;  %v113_v10 = vrot.slane %v105_v1, 1  ;;  %v136_v11 = vrot.slane %v127_v2, 2  ;;  %v173_v18 = vmul.f32 %v1775_v58, %v86_v60 }
 0x144   :  { %v1798_v13 = vsel %vm85_vm1, 0.0, %v1788_v4  ;;  %v159_v21 = vrot.slane %v150_v14, 3  ;;  %v160_v22 = vrot.slane %v151_v15, 3  ;;  %v174_v24 = vmul.f32 %v1775_v58, %v81_v53 }
 0x145   :  { %v115_v16 = vsel %vm85_vm1, %v113_v10, %v114_v5  ;;  %v93_v19 = vmul.f32 %v91_v51, %v1798_v13  ;;  %v138_v23 = vsel %vm135_vm2, %v136_v11, %v137_v12  ;;  %v182_v25 = vrot.slane %v173_v18, 4 }
 0x146   :  { %v121_v20 = vadd.f32 %v115_v16, %v99_v9  ;;  %v196_v26 = vmul.f32 %v1782_v63, %v86_v60  ;;  %v161_v28 = vsel %vm158_vm3, %v159_v21, %v160_v22  ;;  %v197_v29 = vmul.f32 %v1782_v63, %v81_v53 }
 0x147   :  { %v219_v30 = vmul.f32 %v1791_v7, %v86_v60  ;;  %v183_v31 = vrot.slane %v174_v24, 4  ;;  %v220_v35 = vmul.f32 %v1791_v7, %v81_v53  ;;  %v242_v36 = vmul.f32 %v1794_v8, %v86_v60 }
 0x148   :  { %v144_v27 = vadd.f32 %v138_v23, %v121_v20  ;;  %v205_v34 = vrot.slane %v196_v26, 5  ;;  %v206_v38 = vrot.slane %v197_v29, 5  ;;  %v243_v39 = vmul.f32 %v1794_v8, %v81_v53 }
 0x149   :  { %v184_v40 = vsel %vm181_vm4, %v182_v25, %v183_v31  ;;  %v228_v42 = vrot.slane %v219_v30, 6  ;;  %v229_v43 = vrot.slane %v220_v35, 6  ;;  %v107_v47 = vmul.f32 %v1758_v48, %v1798_v13 }
 0x14a   :  { %v167_v37 = vadd.f32 %v161_v28, %v144_v27  ;;  %v100_v50 = vadd.f32 %v1383_v61, %v93_v19  ;;  %v251_v54 = vrot.slane %v242_v36, 7  ;;  %v108_v62 = vmul.f32 %v1758_v48, %v1788_v4 }
 0x14b   :  { %v207_v60 = vsel %vm204_vm5, %v205_v34, %v206_v38  ;;  %v252_v0 = vrot.slane %v243_v39, 7  ;;  %v116_v1 = vrot.slane %v107_v47, 1  ;;  %v129_v53 = vmul.f32 %v1764_v52, %v1798_v13 }
 0x14c   :  { %v190_v51 = vadd.f32 %v184_v40, %v167_v37  ;;  %v117_v3 = vrot.slane %v108_v62, 1  ;;  %v130_v5 = vmul.f32 %v1764_v52, %v1788_v4  ;;  %v230_v61 = vsel %vm227_vm6, %v228_v42, %v229_v43 }
 0x14d   :  { %v139_v9 = vrot.slane %v129_v53, 2  ;;  %v152_v10 = vmul.f32 %v1772_v57, %v1798_v13  ;;  %v153_v48 = vmul.f32 %v1772_v57, %v1788_v4  ;;  %v175_v15 = vmul.f32 %v1775_v58, %v1798_v13 }
 0x14e   :  { %v213_v2 = vadd.f32 %v207_v60, %v190_v51  ;;  %v118_v12 = vsel %vm85_vm1, %v116_v1, %v117_v3  ;;  %v140_v14 = vrot.slane %v130_v5, 2  ;;  %v253_v16 = vsel %vm250_vm7, %v251_v54, %v252_v0 }
 0x14f   :  { %v122_v18 = vadd.f32 %v118_v12, %v100_v50  ;;  %v162_v52 = vrot.slane %v152_v10, 3  ;;  %v163_v19 = vrot.slane %v153_v48, 3  ;;  %v176_v22 = vmul.f32 %v1775_v58, %v1788_v4 }
 0x150   :  { %v236_v11 = vadd.f32 %v230_v61, %v213_v2  ;;  %v141_v21 = vsel %vm135_vm2, %v139_v9, %v140_v14  ;;  %v185_v23 = vrot.slane %v175_v15, 4  ;;  %v198_v25 = vmul.f32 %v1782_v63, %v1798_v13 }
 0x151   :  { %v145_v57 = vadd.f32 %v141_v21, %v122_v18  ;;  %v164_v24 = vsel %vm158_vm3, %v162_v52, %v163_v19  ;;  %v186_v27 = vrot.slane %v176_v22, 4  ;;  %v199_v28 = vmul.f32 %v1782_v63, %v1788_v4  ;;  %v1386_v22 = vld [vmem:[#allocation2 + $0x60] ss:$0 sm:$0xff] }
 0x152   :  { %v259_v20 = vadd.f32 %v253_v16, %v236_v11  ;;  %v221_v29 = vmul.f32 %v1791_v7, %v1798_v13  ;;  %v208_v31 = vrot.slane %v198_v25, 5  ;;  %v222_v58 = vmul.f32 %v1791_v7, %v1788_v4 }
 0x153   :  { %v168_v30 = vadd.f32 %v164_v24, %v145_v57  ;;  %v244_v34 = vmul.f32 %v1794_v8, %v1798_v13  ;;  %v187_v36 = vsel %vm181_vm4, %v185_v23, %v186_v27  ;;  %v209_v37 = vrot.slane %v199_v28, 5 }
 0x154   :  { %v261_v26 = vsub.f32 0.0, %v259_v20  ;;  %v231_v38 = vrot.slane %v221_v29, 6  ;;  %v232_v40 = vrot.slane %v222_v58, 6  ;;  %v245_v63 = vmul.f32 %v1794_v8, %v1788_v4 }
 0x155   :  { %v191_v39 = vadd.f32 %v187_v36, %v168_v30  ;;  %v210_v42 = vsel %vm204_vm5, %v208_v31, %v209_v37  ;;  %v254_v43 = vrot.slane %v244_v34, 7  ;;  %v2426_v11 = vmov 2  }
 0x156   :  { %v263_v35 = vmul.f32 1.442695, %v261_v26  ;;  %v255_v50 = vrot.slane %v245_v63, 7  ;;  %v233_v7 = vsel %vm227_vm6, %v231_v38, %v232_v40  ;;  %v2423_v14 = vmov 6  }
 0x157   :  { %v214_v47 = vadd.f32 %v210_v42, %v191_v39  ;;  %v1703_v16 = vmov 3   ;;  %v2424_v18 = vmov 4   ;;  %v2425_v19 = vmov 5  }
 0x158   :  { %1519 = vpow2.f32 %v263_v35  ;;  %v256_v13 = vsel %vm250_vm7, %v254_v43, %v255_v50  ;;  %v1327_v37 = vsub.f32 0.0, %v1755_v46 }
 0x159   :  { %v237_v51 = vadd.f32 %v233_v7, %v214_v47 }
 0x15a   :  { %v1329_v63 = vmul.f32 1.442695, %v1327_v37 }
 0x15b   :  { %v260_v54 = vadd.f32 %v256_v13, %v237_v51  ;;  %v1945_v51 = vld [vmem:[#allocation2 + $0x68] sm:$0xff] }
 0x15d   :  { %v262_v62 = vsub.f32 0.0, %v260_v54 }
 0x15f   :  { %v265_v60 = vmul.f32 1.442695, %v262_v62 }
 0x161   :  { %1521 = vpow2.f32 %v265_v60 }
 0x162   :  { %v1520_v0 = vpop.eup %1519 }
 0x163   :  { %v267_v1 = vadd.f32 1.0, %v1520_v0 }
 0x165   :  { %1523 = vrcp.f32 %v267_v1 }
 0x16b   :  { %v1522_v53 = vpop.eup %1521 }
 0x16c   :  { %v268_v4 = vadd.f32 1.0, %v1522_v53 }
 0x16e   :  { %1525 = vrcp.f32 %v268_v4 }
 0x16f   :  { %v1524_v8 = vpop.eup %1523 }
 0x170   :  { %v1853_v2 = vmul.f32 %v1524_v8, %v259_v20  ;;  %v2429_v20 = vmov 7  }
 0x172   :  { %2434 = vst [vmem:[#allocation5_spill] sm:$0xff] %v1853_v2  ;;  %1415 = vmatprep.mubr.msk.f32.mxu0 %vm283_vm8, %v1853_v2 }
 0x178   :  { %v1526_v3 = vpop.eup %1525 }
 0x179   :  { %v1857_v5 = vmul.f32 %v1526_v3, %v260_v54 }
 0x17b   :  { %2435 = vst [vmem:[#allocation6_spill] sm:$0xff] %v1857_v5  ;;  %1416 = vmatmul.mubr.msk.f32.vlgmr.msra.gmra.mrb[0].mxu0 %vm283_vm8, %v1857_v5 }
 0x24e   :  { %v1417_v61 = vpop.f32.mrb[0].mxu0 }
 0x24f   :  { %400 = vrot.lane.b32.xlu1 %v1417_v61, %s1700_s0  ;;  %v1862_v9 = vpop.f32.mrb[1].mxu0  ;;  %v1886_v23 = vadd.f32 %v1417_v61, %v1386_v22 }
 0x250   :  { %v1909_v29 = vadd.f32 %v1386_v22, %v1862_v9 }
 0x251   :  { %v375_v57 = vand.u32 2147483647, %v1886_v23  ;;  %v373_v39 = vmax.f32 %v1886_v23, 0.0 }
 0x252   :  { %v374_v31 = vand.u32 2147483647, %v1909_v29 }
 0x253   :  { %398 = vrot.lane.b32.xlu1 %v1862_v9, %s1700_s0  ;;  %v377_v24 = vsub.f32 0.0, %v375_v57 }
 0x254   :  { %v376_v58 = vsub.f32 0.0, %v374_v31 }
 0x255   :  { %v380_v25 = vmul.f32 1.442695, %v377_v24 }
 0x256   :  { %v378_v34 = vmul.f32 1.442695, %v376_v58 }
 0x257   :  { %1527 = vpow2.f32 %v380_v25 }
 0x261   :  { %v1528_v27 = vpop.eup %1527 }
 0x262   :  { %v383_v30 = vadd.f32 1.0, %v1528_v27  ;;  %v372_v27 = vmax.f32 %v1909_v29, 0.0 }
 0x264   :  { %1529 = vlog2.f32 %v383_v30 }
 0x265   :  { %1531 = vpow2.f32 %v378_v34 }
 0x266   :  { %1533 = vpow2.f32 %v1329_v63 }
 0x26e   :  { %v1530_v35 = vpop.eup %1529 }
 0x26f   :  { %v387_v38 = vmul.f32 0.6931472, %v1530_v35  ;;  %v1532_v7 = vpop.eup %1531 }
 0x270   :  { %v382_v13 = vadd.f32 1.0, %v1532_v7  ;;  %v1534_v53 = vpop.eup %1533 }
 0x271   :  { %v1931_v42 = vadd.f32 %v387_v38, %v373_v39  ;;  %v1333_v3 = vadd.f32 1.0, %v1534_v53 }
 0x272   :  { %1535 = vlog2.f32 %v382_v13 }
 0x273   :  { %v1941_v50 = vrot.slane %v1931_v42, %v1743_v32  ;;  %v1957_v0 = vrot.slane %v1931_v42, %v1745_v33  ;;  %v1967_v8 = vrot.slane %v1931_v42, %v1749_v41  ;;  %v1987_v22 = vmul.f32 %v1931_v42, %v1857_v5 }
 0x274   :  { %v1993_v24 = vrot.slane %v1931_v42, %v1753_v45  ;;  %v2004_v31 = vrot.slane %v1931_v42, %v1760_v49  ;;  %v2019_v13 = vrot.slane %v1931_v42, %v1767_v55 }
 0x275   :  { %v480_v54 = vmul.f32 %v1941_v50, %v1945_v51  ;;  %v512_v4 = vmul.f32 %v1957_v0, %v1945_v51  ;;  %v2000_v30 = vrot.slane %v1987_v22, %v1749_v41  ;;  %v2008_v58 = vrot.slane %v1987_v22, %v1743_v32 }
 0x276   :  { %v608_v35 = vmul.f32 %v1993_v24, %v1945_v51  ;;  %v640_v53 = vmul.f32 %v2004_v31, %v1945_v51 }
 0x277   :  { %v492_v1 = vmul.f32 1.442695, %v480_v54 }
 0x279   :  { %1537 = vpow2.f32 %v492_v1  ;;  %v620_v1 = vmul.f32 1.442695, %v608_v35 }
 0x27a   :  { %1539 = vrcp.f32 %v1333_v3  ;;  %v2026_v3 = vrot.slane %v1987_v22, %v1767_v55 }
 0x2c1   :  { %v401_v10 = vpop.permute.xlu1 %400 }
 0x2c2   :  { %436 = vxpose.xlu0.b32.start.end [1/1] (short) (narrow) %v401_v10, 64  ;;  %v524_v10 = vmul.f32 1.442695, %v512_v4 }
 0x2c4   :  { %1541 = vpow2.f32 %v524_v10 }
 0x2c5   :  { %v399_v48 = vpop.permute.xlu1 %398 }
 0x2c6   :  { %404 = vxpose.xlu1.b32.start.end [1/1] (short) (narrow) %v399_v48, 64  ;;  %v544_v48 = vmul.f32 %v1967_v8, %v1945_v51 }
 0x2c8   :  { %v556_v23 = vmul.f32 1.442695, %v544_v48 }
 0x2ca   :  { %1543 = vpow2.f32 %v556_v23 }
 0x2e4   :  { %1450 = vset.pattern.permute.xlu1 %v2428_v6 }
 0x2eb   :  { %1452 = vset.pattern.permute.xlu0 %v2426_v11 }
 0x342   :  { %v452_v12 = vpop.trf.xlu0 }
 0x343   :  { %853 = vperm.xlu0 %1452, %v452_v12   ;;  %754 = vperm.xlu1 %1450, %v452_v12  }
 0x346   :  { %v420_v15 = vpop.trf.xlu1  ;;  %v453_v52 = vpop.trf.xlu0 }
 0x347   :  { %1456 = vset.pattern.permute.xlu0 %v2423_v14  ;;  %1451 = vset.pattern.permute.xlu1 %v2427_v17 }
 0x348   :  { %1045 = vperm.xlu0 %1456, %v452_v12   ;;  %805 = vperm.xlu1 %1451, %v452_v12  }
 0x34a   :  { %v421_v21 = vpop.trf.xlu1  ;;  %v1895_v26 = vpop.trf.xlu0 }
 0x34c   :  { %1461 = vset.pattern.permute.xlu0 %v1703_v16  ;;  %1453 = vset.pattern.permute.xlu1 %v1703_v16 }
 0x34d   :  { %901 = vperm.xlu1 %1453, %v452_v12   ;;  %885 = vperm.xlu0 %1461, %v420_v15  }
 0x34e   :  { %v1906_v28 = vpop.trf.xlu1  ;;  %v1921_v36 = vpop.trf.xlu0 }
 0x351   :  { %1454 = vset.pattern.permute.xlu1 %v2424_v18  ;;  %1464 = vset.pattern.permute.xlu0 %v2423_v14 }
 0x352   :  { %949 = vperm.xlu1 %1454, %v452_v12   ;;  %1029 = vperm.xlu0 %1464, %v420_v15   ;;  %v1929_v40 = vpop.trf.xlu1  ;;  %v456_v43 = vpop.trf.xlu0 }
 0x356   :  { %1455 = vset.pattern.permute.xlu1 %v2425_v19  ;;  %1467 = vset.pattern.permute.xlu0 %v2427_v17  ;;  %v1937_v47 = vpop.trf.xlu1  ;;  %v1953_v62 = vpop.trf.xlu0 }
 0x357   :  { %997 = vperm.xlu1 %1455, %v452_v12   ;;  %809 = vperm.xlu0 %1467, %v453_v52  }
 0x35a   :  { %v425_v60 = vpop.trf.xlu1  ;;  %v1971_v61 = vpop.trf.xlu0 }
 0x35b   :  { %1457 = vset.pattern.permute.xlu1 %v2429_v20  ;;  %1469 = vset.pattern.permute.xlu0 %v1703_v16 }
 0x35c   :  { %1093 = vperm.xlu1 %1457, %v452_v12   ;;  %905 = vperm.xlu0 %1469, %v453_v52   ;;  %v1977_v12 = vrot.slane %v1931_v42, %v1751_v44 }
 0x35e   :  { %v426_v9 = vpop.trf.xlu1  ;;  %v576_v57 = vmul.f32 %v1977_v12, %v1945_v51 }
 0x360   :  { %1458 = vset.pattern.permute.xlu1 %v2428_v6  ;;  %1470 = vset.pattern.permute.xlu0 %v2424_v18  ;;  %v588_v34 = vmul.f32 1.442695, %v576_v57 }
 0x361   :  { %953 = vperm.xlu0 %1470, %v453_v52   ;;  %734 = vperm.xlu1 %1458, %v420_v15  }
 0x362   :  { %1545 = vpow2.f32 %v588_v34  ;;  %v2050_v34 = vrot.slane %v1931_v42, %v1769_v56 }
 0x363   :  { %1547 = vpow2.f32 %v620_v1 }
 0x365   :  { %1471 = vset.pattern.permute.xlu0 %v2425_v19  ;;  %1459 = vset.pattern.permute.xlu1 %v2427_v17 }
 0x366   :  { %1001 = vperm.xlu0 %1471, %v453_v52   ;;  %789 = vperm.xlu1 %1459, %v420_v15  }
 0x36a   :  { %1473 = vset.pattern.permute.xlu0 %v2429_v20  ;;  %1460 = vset.pattern.permute.xlu1 %v2426_v11 }
 0x36b   :  { %1097 = vperm.xlu0 %1473, %v453_v52   ;;  %837 = vperm.xlu1 %1460, %v420_v15  }
 0x36f   :  { %1474 = vset.pattern.permute.xlu0 %v2428_v6  ;;  %1462 = vset.pattern.permute.xlu1 %v2424_v18 }
 0x370   :  { %933 = vperm.xlu1 %1462, %v420_v15   ;;  %739 = vperm.xlu0 %1474, %v421_v21  }
 0x374   :  { %1463 = vset.pattern.permute.xlu1 %v2425_v19  ;;  %1476 = vset.pattern.permute.xlu0 %v2426_v11 }
 0x375   :  { %981 = vperm.xlu1 %1463, %v420_v15   ;;  %841 = vperm.xlu0 %1476, %v421_v21  }
 0x379   :  { %1465 = vset.pattern.permute.xlu1 %v2429_v20  ;;  %1479 = vset.pattern.permute.xlu0 %v2425_v19 }
 0x37a   :  { %1077 = vperm.xlu1 %1465, %v420_v15   ;;  %985 = vperm.xlu0 %1479, %v421_v21   ;;  %v1536_v15 = vpop.eup %1535 }
 0x37b   :  { %v385_v25 = vmul.f32 0.6931472, %v1536_v15 }
 0x37d   :  { %v2012_v38 = vadd.f32 %v385_v25, %v372_v27 }
 0x37e   :  { %1466 = vset.pattern.permute.xlu1 %v2428_v6  ;;  %1481 = vset.pattern.permute.xlu0 %v2429_v20 }
 0x37f   :  { %759 = vperm.xlu1 %1466, %v453_v52   ;;  %1081 = vperm.xlu0 %1481, %v421_v21   ;;  %v2034_v15 = vmul.f32 %v2012_v38, %v1853_v2  ;;  %v2045_v27 = vrot.slane %v2012_v38, %v1743_v32 }
 0x381   :  { %v476_v42 = vmul.f32 %v2045_v27, %v1945_v51 }
 0x383   :  { %1468 = vset.pattern.permute.xlu1 %v2426_v11  ;;  %1484 = vset.pattern.permute.xlu0 %v2426_v11 }
 0x384   :  { %857 = vperm.xlu1 %1468, %v453_v52   ;;  %861 = vperm.xlu0 %1484, %v1895_v26  }
 0x388   :  { %1472 = vset.pattern.permute.xlu1 %v2423_v14  ;;  %1486 = vset.pattern.permute.xlu0 %v2424_v18 }
 0x389   :  { %1049 = vperm.xlu1 %1472, %v453_v52   ;;  %957 = vperm.xlu0 %1486, %v1895_v26   ;;  %v1983_v52 = vpop.trf.xlu0 }
 0x38d   :  { %1475 = vset.pattern.permute.xlu1 %v2427_v17  ;;  %1488 = vset.pattern.permute.xlu0 %v2423_v14 }
 0x38e   :  { %793 = vperm.xlu1 %1475, %v421_v21   ;;  %1053 = vperm.xlu0 %1488, %v1895_v26  }
 0x392   :  { %1477 = vset.pattern.permute.xlu1 %v1703_v16  ;;  %1491 = vset.pattern.permute.xlu0 %v2427_v17 }
 0x393   :  { %889 = vperm.xlu1 %1477, %v421_v21   ;;  %797 = vperm.xlu0 %1491, %v1906_v28  }
 0x397   :  { %1478 = vset.pattern.permute.xlu1 %v2424_v18  ;;  %1495 = vset.pattern.permute.xlu0 %v2425_v19 }
 0x398   :  { %937 = vperm.xlu1 %1478, %v421_v21   ;;  %989 = vperm.xlu0 %1495, %v1906_v28  }
 0x39c   :  { %1480 = vset.pattern.permute.xlu1 %v2423_v14  ;;  %1497 = vset.pattern.permute.xlu0 %v2429_v20 }
 0x39d   :  { %1033 = vperm.xlu1 %1480, %v421_v21   ;;  %1085 = vperm.xlu0 %1497, %v1906_v28   ;;  %v427_v21 = vpop.trf.xlu1 }
 0x3a1   :  { %1482 = vset.pattern.permute.xlu1 %v2428_v6  ;;  %1499 = vset.pattern.permute.xlu0 %v2427_v17 }
 0x3a2   :  { %764 = vperm.xlu1 %1482, %v1895_v26   ;;  %817 = vperm.xlu0 %1499, %v1921_v36  }
 0x3a6   :  { %1483 = vset.pattern.permute.xlu1 %v2427_v17  ;;  %1501 = vset.pattern.permute.xlu0 %v1703_v16 }
 0x3a7   :  { %813 = vperm.xlu1 %1483, %v1895_v26   ;;  %913 = vperm.xlu0 %1501, %v1921_v36  }
 0x3ab   :  { %1485 = vset.pattern.permute.xlu1 %v1703_v16  ;;  %1502 = vset.pattern.permute.xlu0 %v2424_v18 }
 0x3ac   :  { %909 = vperm.xlu1 %1485, %v1895_v26   ;;  %961 = vperm.xlu0 %1502, %v1921_v36  }
 0x3b0   :  { %1487 = vset.pattern.permute.xlu1 %v2425_v19  ;;  %1504 = vset.pattern.permute.xlu0 %v2423_v14 }
 0x3b1   :  { %1005 = vperm.xlu1 %1487, %v1895_v26   ;;  %1057 = vperm.xlu0 %1504, %v1921_v36  }
 0x3b5   :  { %1489 = vset.pattern.permute.xlu1 %v2429_v20  ;;  %1509 = vset.pattern.permute.xlu0 %v1703_v16 }
 0x3b6   :  { %1101 = vperm.xlu1 %1489, %v1895_v26   ;;  %897 = vperm.xlu0 %1509, %v1929_v40   ;;  %v1538_v26 = vpop.eup %1537 }
 0x3b7   :  { %v1120_v63 = vmul.f32 0.0, %v1538_v26  ;;  %v1540_v7 = vpop.eup %1539  ;;  %v672_v26 = vmul.f32 %v2019_v13, %v1945_v51 }
 0x3b8   :  { %v1542_v4 = vpop.eup %1541  ;;  %v1339_v23 = vmul.f32 %v1540_v7, %v1755_v46 }
 0x3b9   :  { %v1544_v35 = vpop.eup %1543  ;;  %v684_v1 = vmul.f32 1.442695, %v672_v26  ;;  %v2082_v26 = vrot.slane %v1987_v22, %v1753_v45 }
 0x3ba   :  { %1490 = vset.pattern.permute.xlu1 %v2428_v6  ;;  %1513 = vset.pattern.permute.xlu0 %v2429_v20 }
 0x3bb   :  { %744 = vperm.xlu1 %1490, %v1906_v28   ;;  %1089 = vperm.xlu0 %1513, %v1929_v40  }
 0x3bf   :  { %1492 = vset.pattern.permute.xlu1 %v2426_v11  ;;  %1266 = vperm.xlu0 %1513, %v456_v43  }
 0x3c0   :  { %845 = vperm.xlu1 %1492, %v1906_v28  }
 0x3c2   :  { %v854_v29 = vpop.permute.xlu0 %853  ;;  %v755_v37 = vpop.permute.xlu1 %754 }
 0x3c3   :  { %v872_v39 = vmul.f32 %v854_v29, %v2000_v30  ;;  %v776_v43 = vmul.f32 %v755_v37, %v2008_v58  ;;  %1251 = vperm.xlu0 %1513, %v425_v60   ;;  %v2055_v29 = vrot.slane %v2034_v15, %v1751_v44  ;;  %v2059_v37 = vrot.slane %v1987_v22, %v1751_v44 }
 0x3c4   :  { %1493 = vset.pattern.permute.xlu1 %v1703_v16  ;;  %v2030_v16 = vrot.slane %v1987_v22, %v1745_v33 }
 0x3c5   :  { %v1128_v54 = vadd.f32 %v1120_v63, %v776_v43  ;;  %893 = vperm.xlu1 %1493, %v1906_v28  }
 0x3c7   :  { %v1046_v60 = vpop.permute.xlu0 %1045  ;;  %1256 = vperm.xlu0 %1513, %v426_v9   ;;  %v1136_v10 = vmul.f32 %v1542_v4, %v1128_v54  ;;  %v806_v48 = vpop.permute.xlu1 %805  ;;  %v652_v9 = vmul.f32 1.442695, %v640_v53  ;;  %v1343_v54 = vrot.slane %v1339_v23, 7  ;;  %v704_v4 = vmul.f32 %v2050_v34, %v1945_v51 }
 0x3c8   :  { %v2038_v57 = vmul.f32 %v1046_v60, %v2026_v3  ;;  %v824_v25 = vmul.f32 %v806_v48, %v2030_v16  ;;  %v1546_v48 = vpop.eup %1545 }
 0x3c9   :  { %1494 = vset.pattern.permute.xlu1 %v2424_v18  ;;  %1549 = vpow2.f32 %v652_v9 }
 0x3ca   :  { %v1144_v46 = vadd.f32 %v1136_v10, %v824_v25  ;;  %941 = vperm.xlu1 %1494, %v1906_v28   ;;  %v2072_v10 = vrot.slane %v2012_v38, %v1745_v33  ;;  %v2078_v25 = vrot.slane %v2034_v15, %v1767_v55  ;;  %1551 = vpow2.f32 %v684_v1 }
 0x3cb   :  { %1261 = vperm.xlu0 %1513, %v427_v21   ;;  %v2098_v1 = vrot.slane %v1987_v22, %v1760_v49 }
 0x3cc   :  { %v1152_v63 = vmul.f32 %v1544_v35, %v1144_v46  ;;  %v886_v43 = vpop.permute.xlu0 %885  ;;  %v902_v7 = vpop.permute.xlu1 %901  ;;  %v716_v35 = vmul.f32 1.442695, %v704_v4 }
 0x3cd   :  { %v2064_v53 = vmul.f32 %v886_v43, %v2055_v29  ;;  %v920_v21 = vmul.f32 %v902_v7, %v2059_v37  ;;  %v508_v7 = vmul.f32 %v2072_v10, %v1945_v51 }
 0x3ce   :  { %v1160_v60 = vadd.f32 %v1152_v63, %v872_v39  ;;  %1496 = vset.pattern.permute.xlu1 %v2423_v14  ;;  %v484_v39 = vmul.f32 1.442695, %v476_v42 }
 0x3cf   :  { %1037 = vperm.xlu1 %1496, %v1906_v28   ;;  %1345 = vrot.lane.b32.xlu0 %v1343_v54, %s1700_s0  ;;  %v1548_v54 = vpop.eup %1547 }
 0x3d0   :  { %v1168_v23 = vmul.f32 %v1546_v48, %v1160_v60  ;;  %v2093_v60 = vrot.slane %v2012_v38, %v1749_v41  ;;  %1553 = vpow2.f32 %v484_v39 }
 0x3d1   :  { %v1030_v9 = vpop.permute.xlu0 %1029  ;;  %v950_v46 = vpop.permute.xlu1 %949  ;;  %1555 = vpow2.f32 %v716_v35 }
 0x3d2   :  { %v1176_v63 = vadd.f32 %v1168_v23, %v920_v21  ;;  %v2085_v43 = vmul.f32 %v1030_v9, %v2078_v25  ;;  %v968_v28 = vmul.f32 %v950_v46, %v2082_v26  ;;  %v516_v23 = vmul.f32 1.442695, %v508_v7 }
 0x3d3   :  { %1498 = vset.pattern.permute.xlu1 %v2428_v6  ;;  %v1550_v9 = vpop.eup %1549  ;;  %v540_v14 = vmul.f32 %v2093_v60, %v1945_v51 }
 0x3d4   :  { %v1184_v42 = vmul.f32 %v1548_v54, %v1176_v63  ;;  %769 = vperm.xlu1 %1498, %v1921_v36   ;;  %v2107_v63 = vrot.slane %v2012_v38, %v1751_v44  ;;  %1557 = vpow2.f32 %v516_v23  ;;  %v1552_v7 = vpop.eup %1551 }
 0x3d6   :  { %v1192_v21 = vadd.f32 %v1184_v42, %v968_v28  ;;  %v2100_v4 = vpop.permute.xlu0 %809  ;;  %v998_v48 = vpop.permute.xlu1 %997  ;;  %v2113_v28 = vrot.slane %v1987_v22, %v1769_v56  ;;  %v572_v18 = vmul.f32 %v2107_v63, %v1945_v51 }
 0x3d7   :  { %v1016_v46 = vmul.f32 %v998_v48, %v2098_v1  ;;  %v548_v48 = vmul.f32 1.442695, %v540_v14 }
 0x3d8   :  { %v1200_v39 = vmul.f32 %v1550_v9, %v1192_v21  ;;  %1500 = vset.pattern.permute.xlu1 %v2426_v11  ;;  %2436 = vst [vmem:[#allocation7_spill] sm:$0xff] %v2113_v28 }
 0x3d9   :  { %865 = vperm.xlu1 %1500, %v1921_v36   ;;  %1559 = vpow2.f32 %v548_v48 }
 0x3da   :  { %v1208_v35 = vadd.f32 %v1200_v39, %v1016_v46  ;;  %v2123_v46 = vrot.slane %v2012_v38, %v1753_v45  ;;  %v1554_v22 = vpop.eup %1553  ;;  %v2130_v39 = vrot.slane %v2034_v15, %v1743_v32 }
 0x3db   :  { %v906_v54 = vpop.permute.xlu0 %905  ;;  %v1094_v42 = vpop.permute.xlu1 %1093 }
 0x3dc   :  { %v1216_v44 = vmul.f32 %v1552_v7, %v1208_v35  ;;  %v2118_v21 = vmul.f32 %v906_v54, %v2059_v37  ;;  %v1112_v9 = vmul.f32 %v1094_v42, %v2113_v28  ;;  %v1556_v23 = vpop.eup %1555  ;;  %v580_v54 = vmul.f32 1.442695, %v572_v18 }
 0x3dd   :  { %1503 = vset.pattern.permute.xlu1 %v2425_v19  ;;  %v604_v42 = vmul.f32 %v2123_v46, %v1945_v51  ;;  %v2136_v19 = vrot.slane %v2012_v38, %v1760_v49  ;;  %v2148_v18 = vrot.slane %v2012_v38, %v1767_v55  ;;  %v2438_v55 = vmov 0  }
 0x3de   :  { %1009 = vperm.xlu1 %1503, %v1921_v36   ;;  %v1224_v14 = vadd.f32 %v1216_v44, %v2038_v57  ;;  %v1116_v44 = vmul.f32 0.0, %v1554_v22  ;;  %v1558_v6 = vpop.eup %1557  ;;  %1561 = vpow2.f32 %v580_v54 }
 0x3df   :  { %v636_v22 = vmul.f32 %v2136_v19, %v1945_v51 }
 0x3e0   :  { %v954_v35 = vpop.permute.xlu0 %953  ;;  %v735_v7 = vpop.permute.xlu1 %734  ;;  %v1232_v11 = vmul.f32 %v1556_v23, %v1224_v14  ;;  %v2152_v14 = vrot.slane %v2034_v15, %v1745_v33  ;;  %v612_v23 = vmul.f32 1.442695, %v604_v42  ;;  %v668_v33 = vmul.f32 %v2148_v18, %v1945_v51 }
 0x3e1   :  { %v2139_v17 = vmul.f32 %v954_v35, %v2082_v26  ;;  %v772_v57 = vmul.f32 %v735_v7, %v2130_v39  ;;  %v644_v42 = vmul.f32 1.442695, %v636_v22 }
 0x3e2   :  { %1505 = vset.pattern.permute.xlu1 %v2429_v20  ;;  %v2143_v32 = vadd.f32 %v1232_v11, %v1112_v9  ;;  %1563 = vpow2.f32 %v612_v23 }
 0x3e3   :  { %v1124_v48 = vadd.f32 %v1116_v44, %v772_v57  ;;  %1105 = vperm.xlu1 %1505, %v1921_v36   ;;  %v2161_v57 = vld [vmem:[#allocation2 + $0x70] sm:$0xff]  ;;  %v1560_v44 = vpop.eup %1559  ;;  %1565 = vpow2.f32 %v644_v42 }
 0x3e4   :  { %2437 = vst [vmem:[#allocation8_spill] sm:$0xff] %v2143_v32 }
 0x3e5   :  { %v1002_v35 = vpop.permute.xlu0 %1001  ;;  %v790_v11 = vpop.permute.xlu1 %789  ;;  %v1132_v9 = vmul.f32 %v1558_v6, %v1124_v48  ;;  %v2168_v6 = vrot.slane %v2012_v38, %v1769_v56  ;;  %v1328_v48 = vsub.f32 0.0, %v1777_v59  ;;  %v2439_v38 = vmov 1  }
 0x3e6   :  { %v2157_v7 = vmul.f32 %v1002_v35, %v2098_v1  ;;  %v820_v36 = vmul.f32 %v790_v11, %v2152_v14  ;;  %v2173_v35 = vrot.slane %v2034_v15, %v1749_v41 }
 0x3e7   :  { %1506 = vset.pattern.permute.xlu1 %v2438_v55  ;;  %v700_v5 = vmul.f32 %v2168_v6, %v1945_v51  ;;  %v1331_v41 = vmul.f32 1.442695, %v1328_v48  ;;  %v2440_v51 = vmov 2  }
 0x3e8   :  { %v1140_v54 = vadd.f32 %v1132_v9, %v820_v36  ;;  %749 = vperm.xlu1 %1506, %v1929_v40   ;;  %v481_v9 = vmul.f32 %v1941_v50, %v2161_v57  ;;  %v676_v36 = vmul.f32 1.442695, %v668_v33  ;;  %v513_v33 = vmul.f32 %v1957_v0, %v2161_v57 }
 0x3e9   :  { %v708_v42 = vmul.f32 1.442695, %v700_v5  ;;  %v545_v5 = vmul.f32 %v1967_v8, %v2161_v57 }
 0x3ea   :  { %v1098_v11 = vpop.permute.xlu0 %1097  ;;  %v838_v55 = vpop.permute.xlu1 %837  ;;  %v1148_v20 = vmul.f32 %v1560_v44, %v1140_v54  ;;  %v2187_v44 = vrot.slane %v2034_v15, %v1753_v45  ;;  %1567 = vpow2.f32 %v676_v36  ;;  %v477_v45 = vmul.f32 %v2045_v27, %v2161_v57 }
 0x3eb   :  { %v2178_v23 = vmul.f32 %v1098_v11, %v2113_v28  ;;  %v868_v22 = vmul.f32 %v838_v55, %v2173_v35  ;;  %v1562_v54 = vpop.eup %1561  ;;  %v494_v11 = vmul.f32 1.442695, %v481_v9  ;;  %1569 = vpow2.f32 %v1331_v41 }
 0x3ec   :  { %1507 = vset.pattern.permute.xlu1 %v2439_v38  ;;  %v1564_v48 = vpop.eup %1563  ;;  %v2441_v36 = vmov 4   ;;  %v486_v41 = vmul.f32 1.442695, %v477_v45 }
 0x3ed   :  { %v1156_v2 = vadd.f32 %v1148_v20, %v868_v22  ;;  %801 = vperm.xlu1 %1507, %v1929_v40   ;;  %1571 = vpow2.f32 %v494_v11  ;;  %v526_v22 = vmul.f32 1.442695, %v513_v33  ;;  %v1566_v38 = vpop.eup %1565  ;;  %v558_v11 = vmul.f32 1.442695, %v545_v5 }
 0x3ee   :  { %1573 = vpow2.f32 %v708_v42  ;;  %v577_v33 = vmul.f32 %v1977_v12, %v2161_v57 }
 0x3ef   :  { %v1164_v32 = vmul.f32 %v1562_v54, %v1156_v2  ;;  %v934_v28 = vpop.permute.xlu1 %933  ;;  %1575 = vpow2.f32 %v526_v22  ;;  %v609_v22 = vmul.f32 %v1993_v24, %v2161_v57 }
 0x3f0   :  { %v964_v55 = vmul.f32 %v934_v28, %v2187_v44  ;;  %v2199_v28 = vrot.slane %v2034_v15, %v1760_v49  ;;  %v2208_v49 = vrot.slane %v2034_v15, %v1769_v56  ;;  %1577 = vpow2.f32 %v486_v41 }
 0x3f1   :  { %v1172_v20 = vadd.f32 %v1164_v32, %v2064_v53  ;;  %1508 = vset.pattern.permute.xlu1 %v2440_v51  ;;  %1579 = vpow2.f32 %v558_v11  ;;  %v590_v15 = vmul.f32 1.442695, %v577_v33  ;;  %v622_v11 = vmul.f32 1.442695, %v609_v22 }
 0x3f2   :  { %849 = vperm.xlu1 %1508, %v1929_v40   ;;  %v641_v33 = vmul.f32 %v2004_v31, %v2161_v57 }
 0x3f3   :  { %v1180_v2 = vmul.f32 %v1564_v48, %v1172_v20  ;;  %1581 = vpow2.f32 %v590_v15 }
 0x3f4   :  { %v982_v9 = vpop.permute.xlu1 %981  ;;  %v1568_v20 = vpop.eup %1567 }
 0x3f5   :  { %v1188_v53 = vadd.f32 %v1180_v2, %v964_v55  ;;  %v1012_v32 = vmul.f32 %v982_v9, %v2199_v28  ;;  %v1570_v48 = vpop.eup %1569  ;;  %v2442_v2 = vmov 5   ;;  %v509_v9 = vmul.f32 %v2072_v10, %v2161_v57 }
 0x3f6   :  { %1510 = vset.pattern.permute.xlu1 %v2441_v36  ;;  %v541_v36 = vmul.f32 %v2093_v60, %v2161_v57 }
 0x3f7   :  { %v1196_v54 = vmul.f32 %v1566_v38, %v1188_v53  ;;  %945 = vperm.xlu1 %1510, %v1929_v40   ;;  %v1572_v56 = vpop.eup %1571 }
 0x3f8   :  { %v1574_v53 = vpop.eup %1573  ;;  %v1121_v41 = vmul.f32 0.0, %v1572_v56  ;;  %v740_v56 = vpop.permute.xlu0 %739  ;;  %v550_v22 = vmul.f32 1.442695, %v541_v36  ;;  %v605_v36 = vmul.f32 %v2123_v46, %v2161_v57 }
 0x3f9   :  { %v1204_v42 = vadd.f32 %v1196_v54, %v1012_v32  ;;  %v1078_v55 = vpop.permute.xlu1 %1077  ;;  %v1334_v32 = vadd.f32 1.0, %v1570_v48  ;;  %v1576_v48 = vpop.eup %1575 }
 0x3fa   :  { %v1108_v51 = vmul.f32 %v1078_v55, %v2208_v49 }
 0x3fb   :  { %v1212_v45 = vmul.f32 %v1568_v20, %v1204_v42  ;;  %1511 = vset.pattern.permute.xlu1 %v2442_v2  ;;  %v518_v42 = vmul.f32 1.442695, %v509_v9  ;;  %v2443_v20 = vmov 6   ;;  %1583 = vrcp.f32 %v1334_v32 }
 0x3fc   :  { %993 = vperm.xlu1 %1511, %v1929_v40   ;;  %v825_v9 = vmul.f32 %v2100_v4, %v2030_v16 }
 0x3fd   :  { %v1220_v5 = vadd.f32 %v1212_v45, %v2085_v43  ;;  %v573_v45 = vmul.f32 %v2107_v63, %v2161_v57  ;;  %1585 = vpow2.f32 %v518_v42 }
 0x3fe   :  { %v760_v38 = vpop.permute.xlu1 %759  ;;  %1587 = vpow2.f32 %v622_v11 }
 0x3ff   :  { %v777_v54 = vmul.f32 %v760_v38, %v2008_v58  ;;  %v1228_v55 = vmul.f32 %v1574_v53, %v1220_v5  ;;  %v654_v38 = vmul.f32 1.442695, %v641_v33  ;;  %1589 = vpow2.f32 %v550_v22 }
 0x400   :  { %1512 = vset.pattern.permute.xlu1 %v2443_v20  ;;  %v582_v42 = vmul.f32 1.442695, %v573_v45  ;;  %v637_v22 = vmul.f32 %v2136_v19, %v2161_v57 }
 0x401   :  { %v1129_v2 = vadd.f32 %v1121_v41, %v777_v54  ;;  %1041 = vperm.xlu1 %1512, %v1929_v40   ;;  %v2227_v43 = vadd.f32 %v1228_v55, %v1108_v51  ;;  %v673_v40 = vmul.f32 %v2019_v13, %v2161_v57  ;;  %v1578_v51 = vpop.eup %1577  ;;  %v2444_v41 = vmov 7  }
 0x402   :  { %v1580_v54 = vpop.eup %1579  ;;  %v773_v55 = vmul.f32 %v740_v56, %v2130_v39  ;;  %v1117_v20 = vmul.f32 0.0, %v1578_v51  ;;  %1591 = vpow2.f32 %v654_v38 }
 0x403   :  { %v1137_v5 = vmul.f32 %v1576_v48, %v1129_v2  ;;  %v858_v15 = vpop.permute.xlu1 %857  ;;  %v686_v11 = vmul.f32 1.442695, %v673_v40  ;;  %v705_v2 = vmul.f32 %v2050_v34, %v2161_v57  ;;  %1593 = vpow2.f32 %v582_v42  ;;  %v842_v42 = vpop.permute.xlu0 %841 }
 0x404   :  { %v873_v53 = vmul.f32 %v858_v15, %v2000_v30  ;;  %v1125_v56 = vadd.f32 %v1117_v20, %v773_v55  ;;  %v614_v15 = vmul.f32 1.442695, %v605_v36  ;;  %v646_v20 = vmul.f32 1.442695, %v637_v22 }
 0x405   :  { %v1145_v32 = vadd.f32 %v1137_v5, %v825_v9  ;;  %1514 = vset.pattern.permute.xlu1 %v2444_v41  ;;  %v1582_v5 = vpop.eup %1581  ;;  %1595 = vpow2.f32 %v686_v11  ;;  %v718_v40 = vmul.f32 1.442695, %v705_v2 }
 0x406   :  { %1246 = vperm.xlu1 %1514, %v1937_v47   ;;  %v2245_v47 = vld [vmem:[#allocation2 + $0x78] sm:$0xff]  ;;  %v1584_v38 = vpop.eup %1583  ;;  %1597 = vpow2.f32 %v614_v15 }
 0x407   :  { %v1153_v4 = vmul.f32 %v1580_v54, %v1145_v32  ;;  %v1586_v51 = vpop.eup %1585  ;;  %v482_v41 = vmul.f32 %v1941_v50, %v2245_v47  ;;  %v1340_v11 = vmul.f32 %v1584_v38, %v1777_v59  ;;  %1599 = vpow2.f32 %v718_v40 }
 0x408   :  { %v1050_v33 = vpop.permute.xlu1 %1049  ;;  %v1588_v54 = vpop.eup %1587  ;;  %v1133_v55 = vmul.f32 %v1586_v51, %v1125_v56  ;;  %v869_v56 = vmul.f32 %v842_v42, %v2173_v35  ;;  %v514_v15 = vmul.f32 %v1957_v0, %v2245_v47  ;;  %1601 = vpow2.f32 %v646_v20 }
 0x409   :  { %v1161_v48 = vadd.f32 %v1153_v4, %v873_v53  ;;  %v1065_v9 = vmul.f32 %v1050_v33, %v2026_v3  ;;  %v669_v4 = vmul.f32 %v2148_v18, %v2161_v57  ;;  %v1590_v33 = vpop.eup %1589  ;;  %v701_v38 = vmul.f32 %v2168_v6, %v2161_v57 }
 0x40a   :  { %1271 = vperm.xlu1 %1514, %v1953_v62   ;;  %v1344_v40 = vrot.slane %v1340_v11, 7  ;;  %v546_v57 = vmul.f32 %v1967_v8, %v2245_v47 }
 0x40b   :  { %v1169_v45 = vmul.f32 %v1582_v5, %v1161_v48  ;;  %v496_v48 = vmul.f32 1.442695, %v482_v41  ;;  %v678_v51 = vmul.f32 1.442695, %v669_v4  ;;  %v710_v4 = vmul.f32 1.442695, %v701_v38 }
 0x40c   :  { %v1592_v5 = vpop.eup %1591 }
 0x40d   :  { %v1177_v53 = vadd.f32 %v1169_v45, %v2118_v21  ;;  %v794_v32 = vpop.permute.xlu1 %793  ;;  %1603 = vpow2.f32 %v496_v48 }
 0x40e   :  { %v821_v62 = vmul.f32 %v794_v32, %v2152_v14  ;;  %1276 = vperm.xlu1 %1514, %v1971_v61   ;;  %1605 = vpow2.f32 %v678_v51 }
 0x40f   :  { %v1185_v36 = vmul.f32 %v1588_v54, %v1177_v53  ;;  %v1594_v53 = vpop.eup %1593  ;;  %v528_v54 = vmul.f32 1.442695, %v514_v15 }
 0x410   :  { %v1141_v21 = vadd.f32 %v1133_v55, %v821_v62  ;;  %v1596_v41 = vpop.eup %1595 }
 0x411   :  { %v1193_v2 = vadd.f32 %v1185_v36, %v2139_v17  ;;  %v1598_v20 = vpop.eup %1597  ;;  %1607 = vpow2.f32 %v528_v54 }
 0x412   :  { %v1149_v45 = vmul.f32 %v1590_v33, %v1141_v21  ;;  %1281 = vperm.xlu1 %1514, %v1983_v52   ;;  %v890_v61 = vpop.permute.xlu1 %889  ;;  %v1600_v21 = vpop.eup %1599  ;;  %1609 = vpow2.f32 %v710_v4 }
 0x413   :  { %v1201_v22 = vmul.f32 %v1592_v5, %v1193_v2  ;;  %v917_v59 = vmul.f32 %v890_v61, %v2055_v29  ;;  %v986_v33 = vpop.permute.xlu0 %985  ;;  %v1602_v61 = vpop.eup %1601 }
 0x414   :  { %v1157_v17 = vadd.f32 %v1149_v45, %v869_v56  ;;  %v560_v56 = vmul.f32 1.442695, %v546_v57  ;;  %v578_v45 = vmul.f32 %v1977_v12, %v2245_v47 }
 0x415   :  { %v1209_v32 = vadd.f32 %v1201_v22, %v2157_v7 }
 0x416   :  { %v1165_v52 = vmul.f32 %v1594_v53, %v1157_v17  ;;  %1347 = vrot.lane.b32.xlu1 %v1344_v40, %s1700_s0  ;;  %1611 = vpow2.f32 %v560_v56  ;;  %v592_v17 = vmul.f32 1.442695, %v578_v45  ;;  %v610_v40 = vmul.f32 %v1993_v24, %v2245_v47 }
 0x417   :  { %v1217_v62 = vmul.f32 %v1596_v41, %v1209_v32  ;;  %v938_v55 = vpop.permute.xlu1 %937  ;;  %v1082_v41 = vpop.permute.xlu0 %1081 }
 0x418   :  { %v1173_v42 = vadd.f32 %v1165_v52, %v917_v59  ;;  %v965_v36 = vmul.f32 %v938_v55, %v2187_v44  ;;  %v1604_v59 = vpop.eup %1603  ;;  %1613 = vpow2.f32 %v592_v17 }
 0x419   :  { %v1225_v11 = vadd.f32 %v1217_v62, %v1065_v9  ;;  %v1013_v9 = vmul.f32 %v986_v33, %v2199_v28  ;;  %v1606_v53 = vpop.eup %1605  ;;  %v1122_v54 = vmul.f32 0.0, %v1604_v59 }
 0x41a   :  { %v1181_v7 = vmul.f32 %v1598_v20, %v1173_v42  ;;  %v1109_v20 = vmul.f32 %v1082_v41, %v2208_v49 }
 0x41b   :  { %v1233_v2 = vmul.f32 %v1600_v21, %v1225_v11  ;;  %v1608_v55 = vpop.eup %1607 }
 0x41c   :  { %v1189_v48 = vadd.f32 %v1181_v7, %v965_v36  ;;  %v1034_v5 = vpop.permute.xlu1 %1033  ;;  %v624_v36 = vmul.f32 1.442695, %v610_v40  ;;  %v1610_v57 = vpop.eup %1609 }
 0x41d   :  { %v1061_v51 = vmul.f32 %v1034_v5, %v2078_v25  ;;  %v2274_v15 = vadd.f32 %v1233_v2, %v2178_v23  ;;  %v642_v23 = vmul.f32 %v2004_v31, %v2245_v47  ;;  %v862_v2 = vpop.permute.xlu0 %861  ;;  %v674_v5 = vmul.f32 %v2019_v13, %v2245_v47 }
 0x41e   :  { %v1197_v22 = vmul.f32 %v1602_v61, %v1189_v48  ;;  %1615 = vpow2.f32 %v624_v36  ;;  %v478_v36 = vmul.f32 %v2045_v27, %v2245_v47 }
 0x41f   :  { %v656_v48 = vmul.f32 1.442695, %v642_v23  ;;  %v688_v59 = vmul.f32 1.442695, %v674_v5 }
 0x420   :  { %v1205_v38 = vadd.f32 %v1197_v22, %v1013_v9  ;;  %v1612_v61 = vpop.eup %1611 }
 0x421   :  { %v765_v32 = vpop.permute.xlu1 %764  ;;  %1617 = vpow2.f32 %v656_v48  ;;  %v958_v41 = vpop.permute.xlu0 %957 }
 0x422   :  { %v1213_v52 = vmul.f32 %v1606_v53, %v1205_v38  ;;  %v778_v62 = vmul.f32 %v765_v32, %v2008_v58  ;;  %v706_v38 = vmul.f32 %v2050_v34, %v2245_v47  ;;  %v1614_v40 = vpop.eup %1613  ;;  %1619 = vpow2.f32 %v688_v59 }
 0x424   :  { %v1221_v4 = vadd.f32 %v1213_v52, %v1061_v51  ;;  %v1130_v42 = vadd.f32 %v1122_v54, %v778_v62  ;;  %v874_v51 = vmul.f32 %v862_v2, %v2000_v30  ;;  %v720_v54 = vmul.f32 1.442695, %v706_v38 }
 0x425   :  { %v488_v2 = vmul.f32 1.442695, %v478_v36  ;;  %v1054_v48 = vpop.permute.xlu0 %1053 }
 0x426   :  { %v1138_v11 = vmul.f32 %v1608_v55, %v1130_v42  ;;  %v814_v21 = vpop.permute.xlu1 %813  ;;  %v1229_v7 = vmul.f32 %v1610_v57, %v1221_v4  ;;  %v970_v4 = vmul.f32 %v958_v41, %v2082_v26  ;;  %1621 = vpow2.f32 %v720_v54 }
 0x427   :  { %v826_v33 = vmul.f32 %v814_v21, %v2030_v16  ;;  %v2445_v21 = vld [vmem:[#allocation7_spill] sm:$0xff]  ;;  %1623 = vpow2.f32 %v488_v2 }
 0x428   :  { %v2286_v56 = vadd.f32 %v1229_v7, %v1109_v20  ;;  %v1616_v55 = vpop.eup %1615 }
 0x429   :  { %v1146_v45 = vadd.f32 %v1138_v11, %v826_v33  ;;  %v798_v41 = vpop.permute.xlu0 %797 }
 0x42b   :  { %v1154_v9 = vmul.f32 %v1612_v61, %v1146_v45  ;;  %v910_v22 = vpop.permute.xlu1 %909  ;;  %v1618_v11 = vpop.eup %1617 }
 0x42c   :  { %v922_v32 = vmul.f32 %v910_v22, %v2059_v37  ;;  %v1620_v45 = vpop.eup %1619  ;;  %v510_v22 = vmul.f32 %v2072_v10, %v2245_v47 }
 0x42d   :  { %v1162_v17 = vadd.f32 %v1154_v9, %v874_v51  ;;  %v1066_v51 = vmul.f32 %v1054_v48, %v2026_v3  ;;  %v2309_v36 = vpop.permute.xlu0 %989 }
 0x42f   :  { %v1170_v53 = vmul.f32 %v1614_v40, %v1162_v17  ;;  %v2300_v17 = vld [vmem:[#allocation2 + $0x80] sm:$0xff]  ;;  %v520_v40 = vmul.f32 1.442695, %v510_v22 }
 0x430   :  { %v1006_v52 = vpop.permute.xlu1 %1005  ;;  %v1622_v38 = vpop.eup %1621  ;;  %v547_v22 = vmul.f32 %v1967_v8, %v2300_v17 }
 0x431   :  { %v1178_v62 = vadd.f32 %v1170_v53, %v922_v32  ;;  %v1018_v23 = vmul.f32 %v1006_v52, %v2098_v1  ;;  %v483_v52 = vmul.f32 %v1941_v50, %v2300_v17  ;;  %1625 = vpow2.f32 %v520_v40  ;;  %v2317_v48 = vpop.permute.xlu0 %1085 }
 0x432   :  { %v515_v50 = vmul.f32 %v1957_v0, %v2300_v17 }
 0x433   :  { %v1186_v42 = vmul.f32 %v1616_v55, %v1178_v62  ;;  %v542_v62 = vmul.f32 %v2093_v60, %v2245_v47  ;;  %v1624_v55 = vpop.eup %1623 }
 0x435   :  { %v1194_v57 = vadd.f32 %v1186_v42, %v970_v4  ;;  %v1102_v20 = vpop.permute.xlu1 %1101  ;;  %v498_v4 = vmul.f32 1.442695, %v483_v52  ;;  %v818_v40 = vpop.permute.xlu0 %817  ;;  %v479_v52 = vmul.f32 %v2045_v27, %v2300_v17  ;;  %v511_v27 = vmul.f32 %v2072_v10, %v2300_v17 }
 0x436   :  { %v1114_v7 = vmul.f32 %v1102_v20, %v2445_v21  ;;  %v1118_v20 = vmul.f32 0.0, %v1624_v55 }
 0x437   :  { %v1202_v33 = vmul.f32 %v1618_v11, %v1194_v57  ;;  %v552_v57 = vmul.f32 1.442695, %v542_v62  ;;  %1627 = vpow2.f32 %v498_v4  ;;  %v562_v4 = vmul.f32 1.442695, %v547_v22 }
 0x439   :  { %v1210_v5 = vadd.f32 %v1202_v33, %v1018_v23  ;;  %1629 = vpow2.f32 %v552_v57  ;;  %v574_v33 = vmul.f32 %v2107_v63, %v2245_v47 }
 0x43a   :  { %v745_v61 = vpop.permute.xlu1 %744 }
 0x43b   :  { %v1218_v9 = vmul.f32 %v1620_v45, %v1210_v5  ;;  %v774_v42 = vmul.f32 %v745_v61, %v2130_v39  ;;  %v1626_v2 = vpop.eup %1625  ;;  %v530_v5 = vmul.f32 1.442695, %v515_v50 }
 0x43d   :  { %v1226_v59 = vadd.f32 %v1218_v9, %v1066_v51  ;;  %v584_v51 = vmul.f32 1.442695, %v574_v33  ;;  %v822_v9 = vmul.f32 %v798_v41, %v2152_v14  ;;  %1631 = vpow2.f32 %v530_v5 }
 0x43f   :  { %v846_v53 = vpop.permute.xlu1 %845  ;;  %v1234_v32 = vmul.f32 %v1622_v38, %v1226_v59  ;;  %v606_v59 = vmul.f32 %v2123_v46, %v2245_v47  ;;  %1633 = vpow2.f32 %v584_v51 }
 0x440   :  { %v870_v8 = vmul.f32 %v846_v53, %v2173_v35  ;;  %1635 = vpow2.f32 %v562_v4  ;;  %v611_v4 = vmul.f32 %v1993_v24, %v2300_v17 }
 0x441   :  { %v2304_v54 = vadd.f32 %v1234_v32, %v1114_v7  ;;  %v1126_v7 = vadd.f32 %v1118_v20, %v774_v42  ;;  %v1628_v38 = vpop.eup %1627  ;;  %v616_v42 = vmul.f32 1.442695, %v606_v59  ;;  %v490_v20 = vmul.f32 1.442695, %v479_v52 }
 0x442   :  { %v1123_v57 = vmul.f32 0.0, %v1628_v38  ;;  %v543_v38 = vmul.f32 %v2093_v60, %v2300_v17  ;;  %v575_v60 = vmul.f32 %v2107_v63, %v2300_v17 }
 0x443   :  { %v1134_v45 = vmul.f32 %v1626_v2, %v1126_v7  ;;  %v1630_v55 = vpop.eup %1629  ;;  %v579_v7 = vmul.f32 %v1977_v12, %v2300_v17  ;;  %v2332_v2 = vpop.permute.xlu0 %913  ;;  %1637 = vpow2.f32 %v616_v42  ;;  %v522_v12 = vmul.f32 1.442695, %v511_v27 }
 0x444   :  { %v894_v23 = vpop.permute.xlu1 %893  ;;  %1639 = vpow2.f32 %v490_v20 }
 0x445   :  { %v1142_v0 = vadd.f32 %v1134_v45, %v822_v9  ;;  %v638_v45 = vmul.f32 %v2136_v19, %v2245_v47  ;;  %v594_v53 = vmul.f32 1.442695, %v579_v7  ;;  %v918_v52 = vmul.f32 %v894_v23, %v2055_v29 }
 0x446   :  { %v626_v7 = vmul.f32 1.442695, %v611_v4 }
 0x447   :  { %v1150_v41 = vmul.f32 %v1630_v55, %v1142_v0  ;;  %v1632_v5 = vpop.eup %1631  ;;  %v827_v0 = vmul.f32 %v818_v40, %v2030_v16  ;;  %v2343_v10 = vpop.permute.xlu0 %961  ;;  %1641 = vpow2.f32 %v594_v53  ;;  %v670_v55 = vmul.f32 %v2148_v18, %v2245_v47 }
 0x448   :  { %1643 = vpow2.f32 %v522_v12  ;;  %v554_v40 = vmul.f32 1.442695, %v543_v38  ;;  %v643_v12 = vmul.f32 %v2004_v31, %v2300_v17 }
 0x449   :  { %v2311_v11 = vpop.permute.xlu1 %941  ;;  %v1634_v9 = vpop.eup %1633 }
 0x44a   :  { %v1636_v42 = vpop.eup %1635  ;;  %v966_v24 = vmul.f32 %v2311_v11, %v2187_v44  ;;  %v658_v4 = vmul.f32 1.442695, %v643_v12 }
 0x44e   :  { %v2319_v61 = vpop.permute.xlu1 %1037 }
 0x453   :  { %v770_v32 = vpop.permute.xlu1 %769 }
 0x454   :  { %v779_v62 = vmul.f32 %v770_v32, %v2008_v58  ;;  %v1158_v58 = vadd.f32 %v1150_v41, %v870_v8  ;;  %v648_v32 = vmul.f32 1.442695, %v638_v45  ;;  %v2354_v8 = vpop.permute.xlu0 %1057  ;;  %v586_v45 = vmul.f32 1.442695, %v575_v60 }
 0x456   :  { %v1131_v50 = vadd.f32 %v1123_v57, %v779_v62  ;;  %v1166_v59 = vmul.f32 %v1634_v9, %v1158_v58  ;;  %1645 = vpow2.f32 %v648_v32  ;;  %v1638_v57 = vpop.eup %1637 }
 0x457   :  { %v1640_v20 = vpop.eup %1639  ;;  %1647 = vpow2.f32 %v554_v40 }
 0x458   :  { %v866_v33 = vpop.permute.xlu1 %865  ;;  %v1139_v51 = vmul.f32 %v1632_v5, %v1131_v50  ;;  %v1174_v41 = vadd.f32 %v1166_v59, %v918_v52  ;;  %v680_v50 = vmul.f32 1.442695, %v670_v55  ;;  %v1119_v9 = vmul.f32 0.0, %v1640_v20  ;;  %v898_v38 = vpop.permute.xlu0 %897 }
 0x459   :  { %v875_v58 = vmul.f32 %v866_v33, %v2000_v30  ;;  %1649 = vpow2.f32 %v626_v7  ;;  %v702_v30 = vmul.f32 %v2168_v6, %v2245_v47 }
 0x45a   :  { %v1147_v62 = vadd.f32 %v1139_v51, %v827_v0  ;;  %v1182_v27 = vmul.f32 %v1638_v57, %v1174_v41  ;;  %v607_v51 = vmul.f32 %v2123_v46, %v2300_v17  ;;  %v1642_v0 = vpop.eup %1641  ;;  %1651 = vpow2.f32 %v680_v50 }
 0x45b   :  { %v1644_v33 = vpop.eup %1643  ;;  %1653 = vpow2.f32 %v586_v45  ;;  %v639_v46 = vmul.f32 %v2136_v19, %v2300_v17  ;;  %v923_v41 = vmul.f32 %v2332_v2, %v2059_v37  ;;  %v712_v47 = vmul.f32 1.442695, %v702_v30 }
 0x45c   :  { %v1155_v23 = vmul.f32 %v1636_v42, %v1147_v62  ;;  %v1190_v59 = vadd.f32 %v1182_v27, %v966_v24  ;;  %v618_v32 = vmul.f32 1.442695, %v607_v51  ;;  %v671_v57 = vmul.f32 %v2148_v18, %v2300_v17  ;;  %v2375_v50 = vpop.permute.xlu0 %1089 }
 0x45d   :  { %v2338_v22 = vpop.permute.xlu1 %1009  ;;  %v650_v60 = vmul.f32 1.442695, %v639_v46  ;;  %v1014_v19 = vmul.f32 %v2309_v36, %v2199_v28  ;;  %v1062_v30 = vmul.f32 %v2319_v61, %v2078_v25 }
 0x45e   :  { %v1163_v63 = vadd.f32 %v1155_v23, %v875_v58  ;;  %1655 = vpow2.f32 %v618_v32  ;;  %v682_v18 = vmul.f32 1.442695, %v671_v57  ;;  %v703_v58 = vmul.f32 %v2168_v6, %v2300_v17 }
 0x45f   :  { %1657 = vpow2.f32 %v658_v4  ;;  %v707_v32 = vmul.f32 %v2050_v34, %v2300_v17 }
 0x460   :  { %v1646_v55 = vpop.eup %1645  ;;  %1659 = vpow2.f32 %v712_v47 }
 0x461   :  { %v1198_v40 = vmul.f32 %v1646_v55, %v1190_v59  ;;  %v1648_v23 = vpop.eup %1647  ;;  %1661 = vpow2.f32 %v650_v60  ;;  %v714_v59 = vmul.f32 1.442695, %v703_v58  ;;  %v722_v61 = vmul.f32 1.442695, %v707_v32 }
 0x462   :  { %v2350_v16 = vpop.permute.xlu1 %1105  ;;  %1663 = vpow2.f32 %v682_v18  ;;  %v2446_v18 = vld [vmem:[#allocation8_spill] sm:$0xff] }
 0x463   :  { %v1206_v7 = vadd.f32 %v1198_v40, %v1014_v19  ;;  %v1650_v27 = vpop.eup %1649 }
 0x464   :  { %v1652_v36 = vpop.eup %1651 }
 0x465   :  { %v1654_v51 = vpop.eup %1653 }
 0x467   :  { %v750_v5 = vpop.permute.xlu1 %749 }
 0x468   :  { %v775_v53 = vmul.f32 %v750_v5, %v2130_v39  ;;  %v1171_v39 = vmul.f32 %v1642_v0, %v1163_v63 }
 0x46a   :  { %v1127_v11 = vadd.f32 %v1119_v9, %v775_v53  ;;  %v1179_v20 = vadd.f32 %v1171_v39, %v923_v41  ;;  %v919_v53 = vmul.f32 %v898_v38, %v2055_v29  ;;  %v1214_v9 = vmul.f32 %v1652_v36, %v1206_v7 }
 0x46b   :  { %v1019_v41 = vmul.f32 %v2338_v22, %v2098_v1  ;;  %v1111_v7 = vmul.f32 %v2375_v50, %v2208_v49 }
 0x46c   :  { %v802_v52 = vpop.permute.xlu1 %801  ;;  %v1135_v62 = vmul.f32 %v1644_v33, %v1127_v11  ;;  %v1187_v5 = vmul.f32 %v1650_v27, %v1179_v20  ;;  %v1656_v33 = vpop.eup %1655  ;;  %v1222_v46 = vadd.f32 %v1214_v9, %v1062_v30 }
 0x46d   :  { %v823_v31 = vmul.f32 %v802_v52, %v2152_v14  ;;  %v675_v14 = vmul.f32 %v2019_v13, %v2300_v17  ;;  %v971_v13 = vmul.f32 %v2343_v10, %v2082_v26  ;;  %v1658_v10 = vpop.eup %1657 }
 0x46e   :  { %v1660_v39 = vpop.eup %1659 }
 0x46f   :  { %v1143_v42 = vadd.f32 %v1135_v62, %v823_v31  ;;  %v690_v63 = vmul.f32 1.442695, %v675_v14  ;;  %v1195_v6 = vadd.f32 %v1187_v5, %v971_v13  ;;  %v1662_v55 = vpop.eup %1661  ;;  %v1230_v31 = vmul.f32 %v1660_v39, %v1222_v46 }
 0x470   :  { %v1664_v60 = vpop.eup %1663 }
 0x471   :  { %v850_v37 = vpop.permute.xlu1 %849  ;;  %v1151_v2 = vmul.f32 %v1648_v23, %v1143_v42  ;;  %1665 = vpow2.f32 %v690_v63  ;;  %v1203_v52 = vmul.f32 %v1658_v10, %v1195_v6  ;;  %v1115_v6 = vmul.f32 %v2350_v16, %v2445_v21  ;;  %v2447_v21 = vld [vmem:[#allocation5_spill] sm:$0xff] }
 0x472   :  { %v871_v24 = vmul.f32 %v850_v37, %v2173_v35  ;;  %v1267_v35 = vpop.permute.xlu0 %1266  ;;  %1667 = vpow2.f32 %v714_v59  ;;  %v1319_v16 = vrot.slane %v2447_v21, 7 }
 0x473   :  { %v1211_v17 = vadd.f32 %v1203_v52, %v1019_v41  ;;  %1669 = vpow2.f32 %v722_v61  ;;  %v1288_v58 = vmul.f32 %v1267_v35, %v2446_v18 }
 0x474   :  { %v1159_v45 = vadd.f32 %v1151_v2, %v871_v24  ;;  %v1067_v2 = vmul.f32 %v2354_v8, %v2026_v3 }
 0x476   :  { %v1167_v12 = vmul.f32 %v1654_v51, %v1159_v45  ;;  %v946_v0 = vpop.permute.xlu1 %945  ;;  %v1252_v4 = vpop.permute.xlu0 %1251 }
 0x477   :  { %v967_v26 = vmul.f32 %v946_v0, %v2187_v44  ;;  %v1110_v44 = vmul.f32 %v2317_v48, %v2208_v49  ;;  %v1285_v37 = vmul.f32 %v1252_v4, %v2286_v56 }
 0x478   :  { %v1175_v11 = vadd.f32 %v1167_v12, %v919_v53 }
 0x479   :  { %v1238_v23 = vadd.f32 %v1230_v31, %v1110_v44  ;;  %v1293_v36 = vsel %vm283_vm8, %v1285_v37, 0.0 }
 0x47a   :  { %v1183_v29 = vmul.f32 %v1656_v33, %v1175_v11  ;;  %v1257_v14 = vpop.permute.xlu0 %1256 }
 0x47b   :  { %v994_v38 = vpop.permute.xlu1 %993  ;;  %v1666_v20 = vpop.eup %1665  ;;  %v1286_v27 = vmul.f32 %v1257_v14, %v1238_v23 }
 0x47c   :  { %v1191_v62 = vadd.f32 %v1183_v29, %v967_v26  ;;  %v1015_v40 = vmul.f32 %v994_v38, %v2199_v28  ;;  %v1219_v1 = vmul.f32 %v1666_v20, %v1211_v17  ;;  %v1668_v28 = vpop.eup %1667 }
 0x47d   :  { %v1295_v8 = vsel %vm283_vm8, %v1286_v27, 0.0  ;;  %v1670_v50 = vpop.eup %1669 }
 0x47e   :  { %v1199_v34 = vmul.f32 %v1662_v55, %v1191_v62  ;;  %v1227_v45 = vadd.f32 %v1219_v1, %v1067_v2  ;;  %v1262_v51 = vpop.permute.xlu0 %1261  ;;  %v1387_v1 = vld [vmem:[#allocation2 + $0x90] ss:$0 sm:$0xff] }
 0x480   :  { %v1207_v47 = vadd.f32 %v1199_v34, %v1015_v40  ;;  %v1042_v42 = vpop.permute.xlu1 %1041  ;;  %v1235_v0 = vmul.f32 %v1670_v50, %v1227_v45  ;;  %v2448_v40 = vld [vmem:[#allocation6_spill] sm:$0xff] }
 0x481   :  { %v1063_v57 = vmul.f32 %v1042_v42, %v2078_v25  ;;  %v1320_v34 = vrot.slane %v2448_v40, 7 }
 0x482   :  { %v1215_v19 = vmul.f32 %v1664_v60, %v1207_v47  ;;  %v1243_v32 = vadd.f32 %v1235_v0, %v1115_v6 }
 0x484   :  { %v1223_v22 = vadd.f32 %v1215_v19, %v1063_v57  ;;  %v1346_v19 = vpop.permute.xlu0 %1345 }
 0x485   :  { %v1247_v48 = vpop.permute.xlu1 %1246 }
 0x486   :  { %v1231_v24 = vmul.f32 %v1668_v28, %v1223_v22  ;;  %v1284_v25 = vmul.f32 %v1247_v48, %v2227_v43  ;;  %v1305_v43 = vsel %vm283_vm8, %v1288_v58, 0.0 }
 0x488   :  { %v1239_v5 = vadd.f32 %v1231_v24, %v1111_v7  ;;  %v1292_v56 = vsel %vm283_vm8, %v1284_v25, 0.0  ;;  %v1388_v24 = vld [vmem:[#allocation2 + $0x98] ss:$0 sm:$0xff] }
 0x489   :  { %v1294_v63 = vadd.f32 %v1293_v36, %v1292_v56  ;;  %v1272_v13 = vpop.permute.xlu1 %1271 }
 0x48a   :  { %v1287_v3 = vmul.f32 %v1262_v51, %v1239_v5  ;;  %v1289_v49 = vmul.f32 %v1272_v13, %v2274_v15 }
 0x48b   :  { %v1296_v53 = vadd.f32 %v1295_v8, %v1294_v63 }
 0x48c   :  { %v1297_v9 = vsel %vm283_vm8, %v1287_v3, 0.0  ;;  %v1306_v12 = vsel %vm283_vm8, %v1289_v49, 0.0 }
 0x48d   :  { %v1298_v35 = vadd.f32 %v1297_v9, %v1296_v53  ;;  %v1307_v59 = vadd.f32 %v1306_v12, %v1305_v43  ;;  %v1277_v30 = vpop.permute.xlu1 %1276 }
 0x48e   :  { %v1290_v11 = vmul.f32 %v1277_v30, %v2304_v54  ;;  %v1318_v54 = vld [vmem:[#allocation2 + $0x88] sm:$0x1] }
 0x48f   :  { %v1299_v33 = vrot.slane %v1298_v35, 4  ;;  %v1323_v47 = vmul.f32 %v1319_v16, %v1318_v54  ;;  %v1324_v60 = vmul.f32 %v1320_v34, %v1318_v54 }
 0x490   :  { %v1308_v15 = vsel %vm283_vm8, %v1290_v11, 0.0 }
 0x491   :  { %v1300_v46 = vadd.f32 %v1299_v33, %v1298_v35  ;;  %v1309_v26 = vadd.f32 %v1308_v15, %v1307_v59  ;;  %v1282_v29 = vpop.permute.xlu1 %1281 }
 0x492   :  { %v1291_v10 = vmul.f32 %v1282_v29, %v1243_v32 }
 0x493   :  { %v1301_v38 = vrot.slane %v1300_v46, 2 }
 0x494   :  { %v1310_v39 = vsel %vm283_vm8, %v1291_v10, 0.0 }
 0x495   :  { %v1302_v52 = vadd.f32 %v1301_v38, %v1300_v46  ;;  %v1311_v62 = vadd.f32 %v1310_v39, %v1309_v26  ;;  %v1348_v20 = vpop.permute.xlu1 %1347 }
 0x497   :  { %v1312_v55 = vrot.slane %v1311_v62, 4  ;;  %v1303_v61 = vrot.slane %v1302_v52, 1 }
 0x499   :  { %v1313_v4 = vadd.f32 %v1312_v55, %v1311_v62  ;;  %v1304_v44 = vadd.f32 %v1303_v61, %v1302_v52 }
 0x49b   :  { %v1314_v31 = vrot.slane %v1313_v4, 2  ;;  %v1325_v57 = vadd.f32 %v1323_v47, %v1304_v44 }
 0x49d   :  { %v1315_v41 = vadd.f32 %v1314_v31, %v1313_v4  ;;  %v1351_v14 = vmul.f32 %v1346_v19, %v1325_v57 }
 0x49f   :  { %v1316_v17 = vrot.slane %v1315_v41, 1  ;;  %v1358_v28 = vmul.f32 %v1387_v1, %v1351_v14 }
 0x4a1   :  { %v1317_v42 = vadd.f32 %v1316_v17, %v1315_v41 }
 0x4a3   :  { %v1326_v23 = vadd.f32 %v1324_v60, %v1317_v42 }
 0x4a5   :  { %v1352_v37 = vmul.f32 %v1348_v20, %v1326_v23 }
 0x4a7   :  { %v1359_v22 = vmul.f32 %v1387_v1, %v1352_v37 }
 0x4a9   :  { %v1362_v2 = vrot.slane %v1359_v22, 7 }
 0x4ab   :  { %v1364_v48 = vsel %vm1363_vm9, %v1362_v2, %v1358_v28 }
 0x4ac   :  { %v1367_v7 = vsel %vm1366_vm10, %v1364_v48, 0.0 }
 0x4ad   :  { %1368 = vadd.xlane.f32.xlu1 %v1367_v7 }
 0x53a   :  { %v1369_v25 = vpop.xlane.xlu1 %1368 }
 0x53b   :  { %v1375_v27 = vadd.f32 %v1388_v24, %v1369_v25 }
 0x53d   :  { %1377 = vst.msk [vmem:[%s2422_s2] sm:$0x3] %vm1376_vm11, %v1375_v27 }
 0x53e   :  { %1382 = vsyncpa [#allocation3], 1 }

</bundles_post_ra>
